<compile_context>
chip_gen: v7x
topology: tpu7x:2x2x1
jax: 0.10.0
libtpu: 0.0.40
codegen_flags: <defaults>
</compile_context>

<pallas_src>
import functools

import jax
import jax.numpy as jnp
import numpy as np
from jax.experimental import pallas as pl
from jax.experimental.pallas import tpu as pltpu


# ----------------------------- Pallas kernel --------------------------------

def _fused_lstm_kernel(*refs, num_layers, T, B, H):
    """refs = [x_flat, (w_ih, w_hh, b) * num_layers, lin_w, lin_b,
               out, hseq_scr, gates_scr]."""
    x_ref = refs[0]
    layer_refs = refs[1:1 + 3 * num_layers]
    lin_w_ref = refs[1 + 3 * num_layers]
    lin_b_ref = refs[2 + 3 * num_layers]
    out_ref = refs[3 + 3 * num_layers]
    hseq_scr = refs[4 + 3 * num_layers]     # (T*B, H)   VMEM
    gates_scr = refs[5 + 3 * num_layers]    # (T*B, 4H)  VMEM

    for layer in range(num_layers):
        w_ih_ref = layer_refs[3 * layer + 0]
        w_hh_ref = layer_refs[3 * layer + 1]
        b_ref = layer_refs[3 * layer + 2]

        # Input projection for ALL time steps as one matmul, bias folded in.
        src = x_ref[...] if layer == 0 else hseq_scr[...]
        gates_scr[...] = (jnp.dot(src, w_ih_ref[...],
                                  preferred_element_type=jnp.float32)
                          + b_ref[...])

        w_hh = w_hh_ref[...]                 # (H, 4H), hoisted out of the loop

        def step(t, carry, _w_hh=w_hh):
            h_prev, c_prev = carry
            row = pl.multiple_of(t * B, B)   # sublane-aligned dynamic offset
            gates = gates_scr[pl.ds(row, B), :] + jnp.dot(
                h_prev, _w_hh, preferred_element_type=jnp.float32)
            # PyTorch gate order: i, f, g, o
            i = jax.nn.sigmoid(gates[:, 0 * H:1 * H])
            f = jax.nn.sigmoid(gates[:, 1 * H:2 * H])
            g = jnp.tanh(gates[:, 2 * H:3 * H])
            o = jax.nn.sigmoid(gates[:, 3 * H:4 * H])
            c_new = f * c_prev + i * g
            h_new = o * jnp.tanh(c_new)
            hseq_scr[pl.ds(row, B), :] = h_new
            return (h_new, c_new)

        init = (jnp.zeros((B, H), jnp.float32),   # h0 = 0 (PyTorch default)
                jnp.zeros((B, H), jnp.float32))   # c0 = 0
        jax.lax.fori_loop(0, T, step, init, unroll=True)

    # Linear head on the last time step of the last layer (still in VMEM).
    last_h = hseq_scr[(T - 1) * B:T * B, :]
    out_ref[...] = (jnp.dot(last_h, lin_w_ref[...],
                            preferred_element_type=jnp.float32)
                    + lin_b_ref[...])


# ------------------------------ Wrapper --------------------------------------

def lstm_forward(x, params):
    """Equivalent of Lstm.forward(x): multi-layer LSTM (h0=c0=0) -> Linear on
    the last time step. x: (B, T, input_size). Returns (B, output_dim)."""
    B, T, D = x.shape
    num_layers = len(params["lstm"])
    H = params["lstm"][0][1].shape[1]          # w_hh: (4H, H)
    O = params["linear_w"].shape[0]

    B_pad = max(8, ((B + 7) // 8) * 8)         # full sublane group
    O_pad = ((O + 127) // 128) * 128           # lane-dense output store

    # (B, T, D) -> (T, B_pad, D) -> (T*B_pad, D)
    x_tm = jnp.transpose(x, (1, 0, 2)).astype(jnp.float32)
    x_tm = jnp.pad(x_tm, ((0, 0), (0, B_pad - B), (0, 0)))
    x_flat = x_tm.reshape(T * B_pad, D)

    layer_args = []
    for (w_ih, w_hh, b_ih, b_hh) in params["lstm"]:
        layer_args += [
            jnp.transpose(w_ih).astype(jnp.float32),           # (D_in, 4H)
            jnp.transpose(w_hh).astype(jnp.float32),           # (H,    4H)
            (b_ih + b_hh).reshape(1, -1).astype(jnp.float32),  # (1,    4H)
        ]

    lin_w = jnp.transpose(params["linear_w"]).astype(jnp.float32)   # (H, O)
    lin_w = jnp.pad(lin_w, ((0, 0), (0, O_pad - O)))
    lin_b = jnp.pad(params["linear_b"].astype(jnp.float32),
                    (0, O_pad - O)).reshape(1, -1)

    kernel = functools.partial(_fused_lstm_kernel,
                               num_layers=num_layers, T=T, B=B_pad, H=H)

    all_inputs = [x_flat] + layer_args + [lin_w, lin_b]
    in_specs = [pl.BlockSpec(a.shape, lambda: (0, 0)) for a in all_inputs]

    out = pl.pallas_call(
        kernel,
        out_shape=jax.ShapeDtypeStruct((B_pad, O_pad), jnp.float32),
        in_specs=in_specs,
        out_specs=pl.BlockSpec((B_pad, O_pad), lambda: (0, 0)),
        scratch_shapes=[
            pltpu.VMEM((T * B_pad, H), jnp.float32),        # hseq (layer i/o)
            pltpu.VMEM((T * B_pad, 4 * H), jnp.float32),    # precomputed gates_x
        ],
    )(*all_inputs)
    return out[:B, :O]


# --------------------------- Pure-JAX reference -----------------------------

def lstm_forward_ref(x, params):
    x_tm = jnp.transpose(x, (1, 0, 2)).astype(jnp.float32)
    for (w_ih, w_hh, b_ih, b_hh) in params["lstm"]:
        H = w_hh.shape[1]
        B = x_tm.shape[1]

        def step(carry, x_t):
            h, c = carry
            gates = x_t @ w_ih.T + h @ w_hh.T + b_ih + b_hh
            i = jax.nn.sigmoid(gates[:, 0 * H:1 * H])
            f = jax.nn.sigmoid(gates[:, 1 * H:2 * H])
            g = jnp.tanh(gates[:, 2 * H:3 * H])
            o = jax.nn.sigmoid(gates[:, 3 * H:4 * H])
            c = f * c + i * g
            h = o * jnp.tanh(c)
            return (h, c), h

        init = (jnp.zeros((B, H), jnp.float32), jnp.zeros((B, H), jnp.float32))
        _, hs = jax.lax.scan(step, init, x_tm)
        x_tm = hs
    return x_tm[-1] @ params["linear_w"].T + params["linear_b"]


# --------------------------------- Main -------------------------------------

def make_params(key, input_size, hidden_dim, output_dim, num_layers):
    s = 1.0 / np.sqrt(hidden_dim)
    keys = jax.random.split(key, 4 * num_layers + 2)
    lstm_params = []
    for layer in range(num_layers):
        d_in = input_size if layer == 0 else hidden_dim
        k0, k1, k2, k3 = keys[4 * layer: 4 * layer + 4]
        w_ih = jax.random.uniform(k0, (4 * hidden_dim, d_in), jnp.float32, -s, s)
        w_hh = jax.random.uniform(k1, (4 * hidden_dim, hidden_dim), jnp.float32, -s, s)
        b_ih = jax.random.uniform(k2, (4 * hidden_dim,), jnp.float32, -s, s)
        b_hh = jax.random.uniform(k3, (4 * hidden_dim,), jnp.float32, -s, s)
        lstm_params.append((w_ih, w_hh, b_ih, b_hh))
    kw, kb = keys[-2], keys[-1]
    linear_w = jax.random.uniform(kw, (output_dim, hidden_dim), jnp.float32, -s, s)
    linear_b = jax.random.uniform(kb, (output_dim,), jnp.float32, -s, s)
    return {"lstm": lstm_params, "linear_w": linear_w, "linear_b": linear_b}


if __name__ == "__main__":
    input_size, hidden_dim, output_dim, num_layers = 8, 32, 4, 2
    batch, seq_len = 2, 8

    key = jax.random.PRNGKey(0)
    kx, kp = jax.random.split(key)
    x = jax.random.normal(kx, (batch, seq_len, input_size), jnp.float32)
    params = make_params(kp, input_size, hidden_dim, output_dim, num_layers)

    out = jax.block_until_ready(lstm_forward(x, params))
    ref = jax.block_until_ready(lstm_forward_ref(x, params))
    np.testing.assert_allclose(np.asarray(out), np.asarray(ref),
                               rtol=1e-5, atol=1e-5)

    assert out.shape == (batch, output_dim)
    print("KERNEL_OK")
</pallas_src>

<mosaic_0001>
module attributes {stable_mosaic.version = 11 : i64} {
  func.func @_fused_lstm_kernel(%arg0: memref<64x8xf32, #tpu.memory_space<vmem>>, %arg1: memref<8x128xf32, #tpu.memory_space<vmem>>, %arg2: memref<32x128xf32, #tpu.memory_space<vmem>>, %arg3: memref<1x128xf32, #tpu.memory_space<vmem>>, %arg4: memref<32x128xf32, #tpu.memory_space<vmem>>, %arg5: memref<32x128xf32, #tpu.memory_space<vmem>>, %arg6: memref<1x128xf32, #tpu.memory_space<vmem>>, %arg7: memref<32x128xf32, #tpu.memory_space<vmem>>, %arg8: memref<1x128xf32, #tpu.memory_space<vmem>>, %arg9: memref<8x128xf32, #tpu.memory_space<vmem>>, %arg10: memref<64x32xf32, #tpu.memory_space<vmem>>, %arg11: memref<64x128xf32, #tpu.memory_space<vmem>>) attributes {dimension_semantics = [], scalar_prefetch = 0 : i64, scratch_operands = 2 : i64, tpu.core_type = #tpu.core_type<tc>} {
    %c0 = arith.constant 0 : index
    %c0_0 = arith.constant 0 : index
    %0 = vector.load %arg0[%c0, %c0_0] : memref<64x8xf32, #tpu.memory_space<vmem>>, vector<64x8xf32>
    %c0_1 = arith.constant 0 : index
    %c0_2 = arith.constant 0 : index
    %1 = vector.load %arg1[%c0_1, %c0_2] : memref<8x128xf32, #tpu.memory_space<vmem>>, vector<8x128xf32>
    %cst = arith.constant dense<0.000000e+00> : vector<64x128xf32>
    %2 = tpu.matmul %0, %1, %cst {dimension_numbers = #tpu.dot_dimension_numbers<[1], [0], [0], [1], [0, 0, 1, 1], [], []>} : vector<64x8xf32>, vector<8x128xf32>, vector<64x128xf32> -> vector<64x128xf32>
    %c0_3 = arith.constant 0 : index
    %c0_4 = arith.constant 0 : index
    %3 = vector.load %arg3[%c0_3, %c0_4] : memref<1x128xf32, #tpu.memory_space<vmem>>, vector<1x128xf32>
    %4 = vector.broadcast %3 : vector<1x128xf32> to vector<64x128xf32>
    %5 = arith.addf %2, %4 : vector<64x128xf32>
    %c0_5 = arith.constant 0 : index
    %c0_6 = arith.constant 0 : index
    %6 = vector.load %arg11[%c0_5, %c0_6] : memref<64x128xf32, #tpu.memory_space<vmem>>, vector<64x128xf32>
    tpu.vector_store %arg11[%c0_5, %c0_6], %5 {strides = array<i32>} : memref<64x128xf32, #tpu.memory_space<vmem>>, vector<64x128xf32>,
    %c0_7 = arith.constant 0 : index
    %c0_8 = arith.constant 0 : index
    %7 = vector.load %arg2[%c0_7, %c0_8] : memref<32x128xf32, #tpu.memory_space<vmem>>, vector<32x128xf32>
    %cst_9 = arith.constant 0.000000e+00 : f32
    %8 = vector.broadcast %cst_9 : f32 to vector<8x32xf32>
    %cst_10 = arith.constant 0.000000e+00 : f32
    %9 = vector.broadcast %cst_10 : f32 to vector<8x32xf32>
    %c0_i32 = arith.constant 0 : i32
    %c8_i32 = arith.constant 8 : i32
    %10 = arith.muli %c0_i32, %c8_i32 : i32
    %11 = tpu.assume_multiple %10, 8 : i32
    %12 = arith.index_cast %11 : i32 to index
    %c0_11 = arith.constant 0 : index
    %13 = vector.load %arg11[%12, %c0_11] : memref<64x128xf32, #tpu.memory_space<vmem>>, vector<8x128xf32>
    %cst_12 = arith.constant dense<0.000000e+00> : vector<8x128xf32>
    %14 = tpu.matmul %8, %7, %cst_12 {dimension_numbers = #tpu.dot_dimension_numbers<[1], [0], [0], [1], [0, 0, 1, 1], [], []>} : vector<8x32xf32>, vector<32x128xf32>, vector<8x128xf32> -> vector<8x128xf32>
    %15 = arith.addf %13, %14 : vector<8x128xf32>
    %16 = vector.extract_strided_slice %15 {offsets = [0, 0], sizes = [8, 32], strides = [1, 1]} : vector<8x128xf32> to vector<8x32xf32>
    %17 = arith.negf %16 : vector<8x32xf32>
    %18 = math.exp %17 : vector<8x32xf32>
    %cst_13 = arith.constant 1.000000e+00 : f32
    %19 = vector.broadcast %cst_13 : f32 to vector<8x32xf32>
    %20 = arith.addf %19, %18 : vector<8x32xf32>
    %21 = arith.divf %19, %20 : vector<8x32xf32>
    %22 = vector.extract_strided_slice %15 {offsets = [0, 32], sizes = [8, 32], strides = [1, 1]} : vector<8x128xf32> to vector<8x32xf32>
    %23 = arith.negf %22 : vector<8x32xf32>
    %24 = math.exp %23 : vector<8x32xf32>
    %cst_14 = arith.constant 1.000000e+00 : f32
    %25 = vector.broadcast %cst_14 : f32 to vector<8x32xf32>
    %26 = arith.addf %25, %24 : vector<8x32xf32>
    %27 = arith.divf %25, %26 : vector<8x32xf32>
    %28 = vector.extract_strided_slice %15 {offsets = [0, 64], sizes = [8, 32], strides = [1, 1]} : vector<8x128xf32> to vector<8x32xf32>
    %29 = math.tanh %28 : vector<8x32xf32>
    %30 = vector.extract_strided_slice %15 {offsets = [0, 96], sizes = [8, 32], strides = [1, 1]} : vector<8x128xf32> to vector<8x32xf32>
    %31 = arith.negf %30 : vector<8x32xf32>
    %32 = math.exp %31 : vector<8x32xf32>
    %cst_15 = arith.constant 1.000000e+00 : f32
    %33 = vector.broadcast %cst_15 : f32 to vector<8x32xf32>
    %34 = arith.addf %33, %32 : vector<8x32xf32>
    %35 = arith.divf %33, %34 : vector<8x32xf32>
    %36 = arith.mulf %27, %9 : vector<8x32xf32>
    %37 = arith.mulf %21, %29 : vector<8x32xf32>
    %38 = arith.addf %36, %37 : vector<8x32xf32>
    %39 = math.tanh %38 : vector<8x32xf32>
    %40 = arith.mulf %35, %39 : vector<8x32xf32>
    %41 = arith.index_cast %11 : i32 to index
    %c0_16 = arith.constant 0 : index
    %42 = vector.load %arg10[%41, %c0_16] : memref<64x32xf32, #tpu.memory_space<vmem>>, vector<8x32xf32>
    tpu.vector_store %arg10[%41, %c0_16], %40 {strides = array<i32>} : memref<64x32xf32, #tpu.memory_space<vmem>>, vector<8x32xf32>,
    %c1_i32 = arith.constant 1 : i32
    %c8_i32_17 = arith.constant 8 : i32
    %43 = arith.muli %c1_i32, %c8_i32_17 : i32
    %44 = tpu.assume_multiple %43, 8 : i32
    %45 = arith.index_cast %44 : i32 to index
    %c0_18 = arith.constant 0 : index
    %46 = vector.load %arg11[%45, %c0_18] : memref<64x128xf32, #tpu.memory_space<vmem>>, vector<8x128xf32>
    %cst_19 = arith.constant dense<0.000000e+00> : vector<8x128xf32>
    %47 = tpu.matmul %40, %7, %cst_19 {dimension_numbers = #tpu.dot_dimension_numbers<[1], [0], [0], [1], [0, 0, 1, 1], [], []>} : vector<8x32xf32>, vector<32x128xf32>, vector<8x128xf32> -> vector<8x128xf32>
    %48 = arith.addf %46, %47 : vector<8x128xf32>
    %49 = vector.extract_strided_slice %48 {offsets = [0, 0], sizes = [8, 32], strides = [1, 1]} : vector<8x128xf32> to vector<8x32xf32>
    %50 = arith.negf %49 : vector<8x32xf32>
    %51 = math.exp %50 : vector<8x32xf32>
    %cst_20 = arith.constant 1.000000e+00 : f32
    %52 = vector.broadcast %cst_20 : f32 to vector<8x32xf32>
    %53 = arith.addf %52, %51 : vector<8x32xf32>
    %54 = arith.divf %52, %53 : vector<8x32xf32>
    %55 = vector.extract_strided_slice %48 {offsets = [0, 32], sizes = [8, 32], strides = [1, 1]} : vector<8x128xf32> to vector<8x32xf32>
    %56 = arith.negf %55 : vector<8x32xf32>
    %57 = math.exp %56 : vector<8x32xf32>
    %cst_21 = arith.constant 1.000000e+00 : f32
    %58 = vector.broadcast %cst_21 : f32 to vector<8x32xf32>
    %59 = arith.addf %58, %57 : vector<8x32xf32>
    %60 = arith.divf %58, %59 : vector<8x32xf32>
    %61 = vector.extract_strided_slice %48 {offsets = [0, 64], sizes = [8, 32], strides = [1, 1]} : vector<8x128xf32> to vector<8x32xf32>
    %62 = math.tanh %61 : vector<8x32xf32>
    %63 = vector.extract_strided_slice %48 {offsets = [0, 96], sizes = [8, 32], strides = [1, 1]} : vector<8x128xf32> to vector<8x32xf32>
    %64 = arith.negf %63 : vector<8x32xf32>
    %65 = math.exp %64 : vector<8x32xf32>
    %cst_22 = arith.constant 1.000000e+00 : f32
    %66 = vector.broadcast %cst_22 : f32 to vector<8x32xf32>
    %67 = arith.addf %66, %65 : vector<8x32xf32>
    %68 = arith.divf %66, %67 : vector<8x32xf32>
    %69 = arith.mulf %60, %38 : vector<8x32xf32>
    %70 = arith.mulf %54, %62 : vector<8x32xf32>
    %71 = arith.addf %69, %70 : vector<8x32xf32>
    %72 = math.tanh %71 : vector<8x32xf32>
    %73 = arith.mulf %68, %72 : vector<8x32xf32>
    %74 = arith.index_cast %44 : i32 to index
    %c0_23 = arith.constant 0 : index
    %75 = vector.load %arg10[%74, %c0_23] : memref<64x32xf32, #tpu.memory_space<vmem>>, vector<8x32xf32>
    tpu.vector_store %arg10[%74, %c0_23], %73 {strides = array<i32>} : memref<64x32xf32, #tpu.memory_space<vmem>>, vector<8x32xf32>,
    %c2_i32 = arith.constant 2 : i32
    %c8_i32_24 = arith.constant 8 : i32
    %76 = arith.muli %c2_i32, %c8_i32_24 : i32
    %77 = tpu.assume_multiple %76, 8 : i32
    %78 = arith.index_cast %77 : i32 to index
    %c0_25 = arith.constant 0 : index
    %79 = vector.load %arg11[%78, %c0_25] : memref<64x128xf32, #tpu.memory_space<vmem>>, vector<8x128xf32>
    %cst_26 = arith.constant dense<0.000000e+00> : vector<8x128xf32>
    %80 = tpu.matmul %73, %7, %cst_26 {dimension_numbers = #tpu.dot_dimension_numbers<[1], [0], [0], [1], [0, 0, 1, 1], [], []>} : vector<8x32xf32>, vector<32x128xf32>, vector<8x128xf32> -> vector<8x128xf32>
    %81 = arith.addf %79, %80 : vector<8x128xf32>
    %82 = vector.extract_strided_slice %81 {offsets = [0, 0], sizes = [8, 32], strides = [1, 1]} : vector<8x128xf32> to vector<8x32xf32>
    %83 = arith.negf %82 : vector<8x32xf32>
    %84 = math.exp %83 : vector<8x32xf32>
    %cst_27 = arith.constant 1.000000e+00 : f32
    %85 = vector.broadcast %cst_27 : f32 to vector<8x32xf32>
    %86 = arith.addf %85, %84 : vector<8x32xf32>
    %87 = arith.divf %85, %86 : vector<8x32xf32>
    %88 = vector.extract_strided_slice %81 {offsets = [0, 32], sizes = [8, 32], strides = [1, 1]} : vector<8x128xf32> to vector<8x32xf32>
    %89 = arith.negf %88 : vector<8x32xf32>
    %90 = math.exp %89 : vector<8x32xf32>
    %cst_28 = arith.constant 1.000000e+00 : f32
    %91 = vector.broadcast %cst_28 : f32 to vector<8x32xf32>
    %92 = arith.addf %91, %90 : vector<8x32xf32>
    %93 = arith.divf %91, %92 : vector<8x32xf32>
    %94 = vector.extract_strided_slice %81 {offsets = [0, 64], sizes = [8, 32], strides = [1, 1]} : vector<8x128xf32> to vector<8x32xf32>
    %95 = math.tanh %94 : vector<8x32xf32>
    %96 = vector.extract_strided_slice %81 {offsets = [0, 96], sizes = [8, 32], strides = [1, 1]} : vector<8x128xf32> to vector<8x32xf32>
    %97 = arith.negf %96 : vector<8x32xf32>
    %98 = math.exp %97 : vector<8x32xf32>
    %cst_29 = arith.constant 1.000000e+00 : f32
    %99 = vector.broadcast %cst_29 : f32 to vector<8x32xf32>
    %100 = arith.addf %99, %98 : vector<8x32xf32>
    %101 = arith.divf %99, %100 : vector<8x32xf32>
    %102 = arith.mulf %93, %71 : vector<8x32xf32>
    %103 = arith.mulf %87, %95 : vector<8x32xf32>
    %104 = arith.addf %102, %103 : vector<8x32xf32>
    %105 = math.tanh %104 : vector<8x32xf32>
    %106 = arith.mulf %101, %105 : vector<8x32xf32>
    %107 = arith.index_cast %77 : i32 to index
    %c0_30 = arith.constant 0 : index
    %108 = vector.load %arg10[%107, %c0_30] : memref<64x32xf32, #tpu.memory_space<vmem>>, vector<8x32xf32>
    tpu.vector_store %arg10[%107, %c0_30], %106 {strides = array<i32>} : memref<64x32xf32, #tpu.memory_space<vmem>>, vector<8x32xf32>,
    %c3_i32 = arith.constant 3 : i32
    %c8_i32_31 = arith.constant 8 : i32
    %109 = arith.muli %c3_i32, %c8_i32_31 : i32
    %110 = tpu.assume_multiple %109, 8 : i32
    %111 = arith.index_cast %110 : i32 to index
    %c0_32 = arith.constant 0 : index
    %112 = vector.load %arg11[%111, %c0_32] : memref<64x128xf32, #tpu.memory_space<vmem>>, vector<8x128xf32>
    %cst_33 = arith.constant dense<0.000000e+00> : vector<8x128xf32>
    %113 = tpu.matmul %106, %7, %cst_33 {dimension_numbers = #tpu.dot_dimension_numbers<[1], [0], [0], [1], [0, 0, 1, 1], [], []>} : vector<8x32xf32>, vector<32x128xf32>, vector<8x128xf32> -> vector<8x128xf32>
    %114 = arith.addf %112, %113 : vector<8x128xf32>
    %115 = vector.extract_strided_slice %114 {offsets = [0, 0], sizes = [8, 32], strides = [1, 1]} : vector<8x128xf32> to vector<8x32xf32>
    %116 = arith.negf %115 : vector<8x32xf32>
    %117 = math.exp %116 : vector<8x32xf32>
    %cst_34 = arith.constant 1.000000e+00 : f32
    %118 = vector.broadcast %cst_34 : f32 to vector<8x32xf32>
    %119 = arith.addf %118, %117 : vector<8x32xf32>
    %120 = arith.divf %118, %119 : vector<8x32xf32>
    %121 = vector.extract_strided_slice %114 {offsets = [0, 32], sizes = [8, 32], strides = [1, 1]} : vector<8x128xf32> to vector<8x32xf32>
    %122 = arith.negf %121 : vector<8x32xf32>
    %123 = math.exp %122 : vector<8x32xf32>
    %cst_35 = arith.constant 1.000000e+00 : f32
    %124 = vector.broadcast %cst_35 : f32 to vector<8x32xf32>
    %125 = arith.addf %124, %123 : vector<8x32xf32>
    %126 = arith.divf %124, %125 : vector<8x32xf32>
    %127 = vector.extract_strided_slice %114 {offsets = [0, 64], sizes = [8, 32], strides = [1, 1]} : vector<8x128xf32> to vector<8x32xf32>
    %128 = math.tanh %127 : vector<8x32xf32>
    %129 = vector.extract_strided_slice %114 {offsets = [0, 96], sizes = [8, 32], strides = [1, 1]} : vector<8x128xf32> to vector<8x32xf32>
    %130 = arith.negf %129 : vector<8x32xf32>
    %131 = math.exp %130 : vector<8x32xf32>
    %cst_36 = arith.constant 1.000000e+00 : f32
    %132 = vector.broadcast %cst_36 : f32 to vector<8x32xf32>
    %133 = arith.addf %132, %131 : vector<8x32xf32>
    %134 = arith.divf %132, %133 : vector<8x32xf32>
    %135 = arith.mulf %126, %104 : vector<8x32xf32>
    %136 = arith.mulf %120, %128 : vector<8x32xf32>
    %137 = arith.addf %135, %136 : vector<8x32xf32>
    %138 = math.tanh %137 : vector<8x32xf32>
    %139 = arith.mulf %134, %138 : vector<8x32xf32>
    %140 = arith.index_cast %110 : i32 to index
    %c0_37 = arith.constant 0 : index
    %141 = vector.load %arg10[%140, %c0_37] : memref<64x32xf32, #tpu.memory_space<vmem>>, vector<8x32xf32>
    tpu.vector_store %arg10[%140, %c0_37], %139 {strides = array<i32>} : memref<64x32xf32, #tpu.memory_space<vmem>>, vector<8x32xf32>,
    %c4_i32 = arith.constant 4 : i32
    %c8_i32_38 = arith.constant 8 : i32
    %142 = arith.muli %c4_i32, %c8_i32_38 : i32
    %143 = tpu.assume_multiple %142, 8 : i32
    %144 = arith.index_cast %143 : i32 to index
    %c0_39 = arith.constant 0 : index
    %145 = vector.load %arg11[%144, %c0_39] : memref<64x128xf32, #tpu.memory_space<vmem>>, vector<8x128xf32>
    %cst_40 = arith.constant dense<0.000000e+00> : vector<8x128xf32>
    %146 = tpu.matmul %139, %7, %cst_40 {dimension_numbers = #tpu.dot_dimension_numbers<[1], [0], [0], [1], [0, 0, 1, 1], [], []>} : vector<8x32xf32>, vector<32x128xf32>, vector<8x128xf32> -> vector<8x128xf32>
    %147 = arith.addf %145, %146 : vector<8x128xf32>
    %148 = vector.extract_strided_slice %147 {offsets = [0, 0], sizes = [8, 32], strides = [1, 1]} : vector<8x128xf32> to vector<8x32xf32>
    %149 = arith.negf %148 : vector<8x32xf32>
    %150 = math.exp %149 : vector<8x32xf32>
    %cst_41 = arith.constant 1.000000e+00 : f32
    %151 = vector.broadcast %cst_41 : f32 to vector<8x32xf32>
    %152 = arith.addf %151, %150 : vector<8x32xf32>
    %153 = arith.divf %151, %152 : vector<8x32xf32>
    %154 = vector.extract_strided_slice %147 {offsets = [0, 32], sizes = [8, 32], strides = [1, 1]} : vector<8x128xf32> to vector<8x32xf32>
    %155 = arith.negf %154 : vector<8x32xf32>
    %156 = math.exp %155 : vector<8x32xf32>
    %cst_42 = arith.constant 1.000000e+00 : f32
    %157 = vector.broadcast %cst_42 : f32 to vector<8x32xf32>
    %158 = arith.addf %157, %156 : vector<8x32xf32>
    %159 = arith.divf %157, %158 : vector<8x32xf32>
    %160 = vector.extract_strided_slice %147 {offsets = [0, 64], sizes = [8, 32], strides = [1, 1]} : vector<8x128xf32> to vector<8x32xf32>
    %161 = math.tanh %160 : vector<8x32xf32>
    %162 = vector.extract_strided_slice %147 {offsets = [0, 96], sizes = [8, 32], strides = [1, 1]} : vector<8x128xf32> to vector<8x32xf32>
    %163 = arith.negf %162 : vector<8x32xf32>
    %164 = math.exp %163 : vector<8x32xf32>
    %cst_43 = arith.constant 1.000000e+00 : f32
    %165 = vector.broadcast %cst_43 : f32 to vector<8x32xf32>
    %166 = arith.addf %165, %164 : vector<8x32xf32>
    %167 = arith.divf %165, %166 : vector<8x32xf32>
    %168 = arith.mulf %159, %137 : vector<8x32xf32>
    %169 = arith.mulf %153, %161 : vector<8x32xf32>
    %170 = arith.addf %168, %169 : vector<8x32xf32>
    %171 = math.tanh %170 : vector<8x32xf32>
    %172 = arith.mulf %167, %171 : vector<8x32xf32>
    %173 = arith.index_cast %143 : i32 to index
    %c0_44 = arith.constant 0 : index
    %174 = vector.load %arg10[%173, %c0_44] : memref<64x32xf32, #tpu.memory_space<vmem>>, vector<8x32xf32>
    tpu.vector_store %arg10[%173, %c0_44], %172 {strides = array<i32>} : memref<64x32xf32, #tpu.memory_space<vmem>>, vector<8x32xf32>,
    %c5_i32 = arith.constant 5 : i32
    %c8_i32_45 = arith.constant 8 : i32
    %175 = arith.muli %c5_i32, %c8_i32_45 : i32
    %176 = tpu.assume_multiple %175, 8 : i32
    %177 = arith.index_cast %176 : i32 to index
    %c0_46 = arith.constant 0 : index
    %178 = vector.load %arg11[%177, %c0_46] : memref<64x128xf32, #tpu.memory_space<vmem>>, vector<8x128xf32>
    %cst_47 = arith.constant dense<0.000000e+00> : vector<8x128xf32>
    %179 = tpu.matmul %172, %7, %cst_47 {dimension_numbers = #tpu.dot_dimension_numbers<[1], [0], [0], [1], [0, 0, 1, 1], [], []>} : vector<8x32xf32>, vector<32x128xf32>, vector<8x128xf32> -> vector<8x128xf32>
    %180 = arith.addf %178, %179 : vector<8x128xf32>
    %181 = vector.extract_strided_slice %180 {offsets = [0, 0], sizes = [8, 32], strides = [1, 1]} : vector<8x128xf32> to vector<8x32xf32>
    %182 = arith.negf %181 : vector<8x32xf32>
    %183 = math.exp %182 : vector<8x32xf32>
    %cst_48 = arith.constant 1.000000e+00 : f32
    %184 = vector.broadcast %cst_48 : f32 to vector<8x32xf32>
    %185 = arith.addf %184, %183 : vector<8x32xf32>
    %186 = arith.divf %184, %185 : vector<8x32xf32>
    %187 = vector.extract_strided_slice %180 {offsets = [0, 32], sizes = [8, 32], strides = [1, 1]} : vector<8x128xf32> to vector<8x32xf32>
    %188 = arith.negf %187 : vector<8x32xf32>
    %189 = math.exp %188 : vector<8x32xf32>
    %cst_49 = arith.constant 1.000000e+00 : f32
    %190 = vector.broadcast %cst_49 : f32 to vector<8x32xf32>
    %191 = arith.addf %190, %189 : vector<8x32xf32>
    %192 = arith.divf %190, %191 : vector<8x32xf32>
    %193 = vector.extract_strided_slice %180 {offsets = [0, 64], sizes = [8, 32], strides = [1, 1]} : vector<8x128xf32> to vector<8x32xf32>
    %194 = math.tanh %193 : vector<8x32xf32>
    %195 = vector.extract_strided_slice %180 {offsets = [0, 96], sizes = [8, 32], strides = [1, 1]} : vector<8x128xf32> to vector<8x32xf32>
    %196 = arith.negf %195 : vector<8x32xf32>
    %197 = math.exp %196 : vector<8x32xf32>
    %cst_50 = arith.constant 1.000000e+00 : f32
    %198 = vector.broadcast %cst_50 : f32 to vector<8x32xf32>
    %199 = arith.addf %198, %197 : vector<8x32xf32>
    %200 = arith.divf %198, %199 : vector<8x32xf32>
    %201 = arith.mulf %192, %170 : vector<8x32xf32>
    %202 = arith.mulf %186, %194 : vector<8x32xf32>
    %203 = arith.addf %201, %202 : vector<8x32xf32>
    %204 = math.tanh %203 : vector<8x32xf32>
    %205 = arith.mulf %200, %204 : vector<8x32xf32>
    %206 = arith.index_cast %176 : i32 to index
    %c0_51 = arith.constant 0 : index
    %207 = vector.load %arg10[%206, %c0_51] : memref<64x32xf32, #tpu.memory_space<vmem>>, vector<8x32xf32>
    tpu.vector_store %arg10[%206, %c0_51], %205 {strides = array<i32>} : memref<64x32xf32, #tpu.memory_space<vmem>>, vector<8x32xf32>,
    %c6_i32 = arith.constant 6 : i32
    %c8_i32_52 = arith.constant 8 : i32
    %208 = arith.muli %c6_i32, %c8_i32_52 : i32
    %209 = tpu.assume_multiple %208, 8 : i32
    %210 = arith.index_cast %209 : i32 to index
    %c0_53 = arith.constant 0 : index
    %211 = vector.load %arg11[%210, %c0_53] : memref<64x128xf32, #tpu.memory_space<vmem>>, vector<8x128xf32>
    %cst_54 = arith.constant dense<0.000000e+00> : vector<8x128xf32>
    %212 = tpu.matmul %205, %7, %cst_54 {dimension_numbers = #tpu.dot_dimension_numbers<[1], [0], [0], [1], [0, 0, 1, 1], [], []>} : vector<8x32xf32>, vector<32x128xf32>, vector<8x128xf32> -> vector<8x128xf32>
    %213 = arith.addf %211, %212 : vector<8x128xf32>
    %214 = vector.extract_strided_slice %213 {offsets = [0, 0], sizes = [8, 32], strides = [1, 1]} : vector<8x128xf32> to vector<8x32xf32>
    %215 = arith.negf %214 : vector<8x32xf32>
    %216 = math.exp %215 : vector<8x32xf32>
    %cst_55 = arith.constant 1.000000e+00 : f32
    %217 = vector.broadcast %cst_55 : f32 to vector<8x32xf32>
    %218 = arith.addf %217, %216 : vector<8x32xf32>
    %219 = arith.divf %217, %218 : vector<8x32xf32>
    %220 = vector.extract_strided_slice %213 {offsets = [0, 32], sizes = [8, 32], strides = [1, 1]} : vector<8x128xf32> to vector<8x32xf32>
    %221 = arith.negf %220 : vector<8x32xf32>
    %222 = math.exp %221 : vector<8x32xf32>
    %cst_56 = arith.constant 1.000000e+00 : f32
    %223 = vector.broadcast %cst_56 : f32 to vector<8x32xf32>
    %224 = arith.addf %223, %222 : vector<8x32xf32>
    %225 = arith.divf %223, %224 : vector<8x32xf32>
    %226 = vector.extract_strided_slice %213 {offsets = [0, 64], sizes = [8, 32], strides = [1, 1]} : vector<8x128xf32> to vector<8x32xf32>
    %227 = math.tanh %226 : vector<8x32xf32>
    %228 = vector.extract_strided_slice %213 {offsets = [0, 96], sizes = [8, 32], strides = [1, 1]} : vector<8x128xf32> to vector<8x32xf32>
    %229 = arith.negf %228 : vector<8x32xf32>
    %230 = math.exp %229 : vector<8x32xf32>
    %cst_57 = arith.constant 1.000000e+00 : f32
    %231 = vector.broadcast %cst_57 : f32 to vector<8x32xf32>
    %232 = arith.addf %231, %230 : vector<8x32xf32>
    %233 = arith.divf %231, %232 : vector<8x32xf32>
    %234 = arith.mulf %225, %203 : vector<8x32xf32>
    %235 = arith.mulf %219, %227 : vector<8x32xf32>
    %236 = arith.addf %234, %235 : vector<8x32xf32>
    %237 = math.tanh %236 : vector<8x32xf32>
    %238 = arith.mulf %233, %237 : vector<8x32xf32>
    %239 = arith.index_cast %209 : i32 to index
    %c0_58 = arith.constant 0 : index
    %240 = vector.load %arg10[%239, %c0_58] : memref<64x32xf32, #tpu.memory_space<vmem>>, vector<8x32xf32>
    tpu.vector_store %arg10[%239, %c0_58], %238 {strides = array<i32>} : memref<64x32xf32, #tpu.memory_space<vmem>>, vector<8x32xf32>,
    %c7_i32 = arith.constant 7 : i32
    %c8_i32_59 = arith.constant 8 : i32
    %241 = arith.muli %c7_i32, %c8_i32_59 : i32
    %242 = tpu.assume_multiple %241, 8 : i32
    %243 = arith.index_cast %242 : i32 to index
    %c0_60 = arith.constant 0 : index
    %244 = vector.load %arg11[%243, %c0_60] : memref<64x128xf32, #tpu.memory_space<vmem>>, vector<8x128xf32>
    %cst_61 = arith.constant dense<0.000000e+00> : vector<8x128xf32>
    %245 = tpu.matmul %238, %7, %cst_61 {dimension_numbers = #tpu.dot_dimension_numbers<[1], [0], [0], [1], [0, 0, 1, 1], [], []>} : vector<8x32xf32>, vector<32x128xf32>, vector<8x128xf32> -> vector<8x128xf32>
    %246 = arith.addf %244, %245 : vector<8x128xf32>
    %247 = vector.extract_strided_slice %246 {offsets = [0, 0], sizes = [8, 32], strides = [1, 1]} : vector<8x128xf32> to vector<8x32xf32>
    %248 = arith.negf %247 : vector<8x32xf32>
    %249 = math.exp %248 : vector<8x32xf32>
    %cst_62 = arith.constant 1.000000e+00 : f32
    %250 = vector.broadcast %cst_62 : f32 to vector<8x32xf32>
    %251 = arith.addf %250, %249 : vector<8x32xf32>
    %252 = arith.divf %250, %251 : vector<8x32xf32>
    %253 = vector.extract_strided_slice %246 {offsets = [0, 32], sizes = [8, 32], strides = [1, 1]} : vector<8x128xf32> to vector<8x32xf32>
    %254 = arith.negf %253 : vector<8x32xf32>
    %255 = math.exp %254 : vector<8x32xf32>
    %cst_63 = arith.constant 1.000000e+00 : f32
    %256 = vector.broadcast %cst_63 : f32 to vector<8x32xf32>
    %257 = arith.addf %256, %255 : vector<8x32xf32>
    %258 = arith.divf %256, %257 : vector<8x32xf32>
    %259 = vector.extract_strided_slice %246 {offsets = [0, 64], sizes = [8, 32], strides = [1, 1]} : vector<8x128xf32> to vector<8x32xf32>
    %260 = math.tanh %259 : vector<8x32xf32>
    %261 = vector.extract_strided_slice %246 {offsets = [0, 96], sizes = [8, 32], strides = [1, 1]} : vector<8x128xf32> to vector<8x32xf32>
    %262 = arith.negf %261 : vector<8x32xf32>
    %263 = math.exp %262 : vector<8x32xf32>
    %cst_64 = arith.constant 1.000000e+00 : f32
    %264 = vector.broadcast %cst_64 : f32 to vector<8x32xf32>
    %265 = arith.addf %264, %263 : vector<8x32xf32>
    %266 = arith.divf %264, %265 : vector<8x32xf32>
    %267 = arith.mulf %258, %236 : vector<8x32xf32>
    %268 = arith.mulf %252, %260 : vector<8x32xf32>
    %269 = arith.addf %267, %268 : vector<8x32xf32>
    %270 = math.tanh %269 : vector<8x32xf32>
    %271 = arith.mulf %266, %270 : vector<8x32xf32>
    %272 = arith.index_cast %242 : i32 to index
    %c0_65 = arith.constant 0 : index
    %273 = vector.load %arg10[%272, %c0_65] : memref<64x32xf32, #tpu.memory_space<vmem>>, vector<8x32xf32>
    tpu.vector_store %arg10[%272, %c0_65], %271 {strides = array<i32>} : memref<64x32xf32, #tpu.memory_space<vmem>>, vector<8x32xf32>,
    %c8_i32_66 = arith.constant 8 : i32
    %c0_67 = arith.constant 0 : index
    %c0_68 = arith.constant 0 : index
    %274 = vector.load %arg10[%c0_67, %c0_68] : memref<64x32xf32, #tpu.memory_space<vmem>>, vector<64x32xf32>
    %c0_69 = arith.constant 0 : index
    %c0_70 = arith.constant 0 : index
    %275 = vector.load %arg4[%c0_69, %c0_70] : memref<32x128xf32, #tpu.memory_space<vmem>>, vector<32x128xf32>
    %cst_71 = arith.constant dense<0.000000e+00> : vector<64x128xf32>
    %276 = tpu.matmul %274, %275, %cst_71 {dimension_numbers = #tpu.dot_dimension_numbers<[1], [0], [0], [1], [0, 0, 1, 1], [], []>} : vector<64x32xf32>, vector<32x128xf32>, vector<64x128xf32> -> vector<64x128xf32>
    %c0_72 = arith.constant 0 : index
    %c0_73 = arith.constant 0 : index
    %277 = vector.load %arg6[%c0_72, %c0_73] : memref<1x128xf32, #tpu.memory_space<vmem>>, vector<1x128xf32>
    %278 = vector.broadcast %277 : vector<1x128xf32> to vector<64x128xf32>
    %279 = arith.addf %276, %278 : vector<64x128xf32>
    %c0_74 = arith.constant 0 : index
    %c0_75 = arith.constant 0 : index
    %280 = vector.load %arg11[%c0_74, %c0_75] : memref<64x128xf32, #tpu.memory_space<vmem>>, vector<64x128xf32>
    tpu.vector_store %arg11[%c0_74, %c0_75], %279 {strides = array<i32>} : memref<64x128xf32, #tpu.memory_space<vmem>>, vector<64x128xf32>,
    %c0_76 = arith.constant 0 : index
    %c0_77 = arith.constant 0 : index
    %281 = vector.load %arg5[%c0_76, %c0_77] : memref<32x128xf32, #tpu.memory_space<vmem>>, vector<32x128xf32>
    %cst_78 = arith.constant 0.000000e+00 : f32
    %282 = vector.broadcast %cst_78 : f32 to vector<8x32xf32>
    %cst_79 = arith.constant 0.000000e+00 : f32
    %283 = vector.broadcast %cst_79 : f32 to vector<8x32xf32>
    %c0_i32_80 = arith.constant 0 : i32
    %c8_i32_81 = arith.constant 8 : i32
    %284 = arith.muli %c0_i32_80, %c8_i32_81 : i32
    %285 = tpu.assume_multiple %284, 8 : i32
    %286 = arith.index_cast %285 : i32 to index
    %c0_82 = arith.constant 0 : index
    %287 = vector.load %arg11[%286, %c0_82] : memref<64x128xf32, #tpu.memory_space<vmem>>, vector<8x128xf32>
    %cst_83 = arith.constant dense<0.000000e+00> : vector<8x128xf32>
    %288 = tpu.matmul %282, %281, %cst_83 {dimension_numbers = #tpu.dot_dimension_numbers<[1], [0], [0], [1], [0, 0, 1, 1], [], []>} : vector<8x32xf32>, vector<32x128xf32>, vector<8x128xf32> -> vector<8x128xf32>
    %289 = arith.addf %287, %288 : vector<8x128xf32>
    %290 = vector.extract_strided_slice %289 {offsets = [0, 0], sizes = [8, 32], strides = [1, 1]} : vector<8x128xf32> to vector<8x32xf32>
    %291 = arith.negf %290 : vector<8x32xf32>
    %292 = math.exp %291 : vector<8x32xf32>
    %cst_84 = arith.constant 1.000000e+00 : f32
    %293 = vector.broadcast %cst_84 : f32 to vector<8x32xf32>
    %294 = arith.addf %293, %292 : vector<8x32xf32>
    %295 = arith.divf %293, %294 : vector<8x32xf32>
    %296 = vector.extract_strided_slice %289 {offsets = [0, 32], sizes = [8, 32], strides = [1, 1]} : vector<8x128xf32> to vector<8x32xf32>
    %297 = arith.negf %296 : vector<8x32xf32>
    %298 = math.exp %297 : vector<8x32xf32>
    %cst_85 = arith.constant 1.000000e+00 : f32
    %299 = vector.broadcast %cst_85 : f32 to vector<8x32xf32>
    %300 = arith.addf %299, %298 : vector<8x32xf32>
    %301 = arith.divf %299, %300 : vector<8x32xf32>
    %302 = vector.extract_strided_slice %289 {offsets = [0, 64], sizes = [8, 32], strides = [1, 1]} : vector<8x128xf32> to vector<8x32xf32>
    %303 = math.tanh %302 : vector<8x32xf32>
    %304 = vector.extract_strided_slice %289 {offsets = [0, 96], sizes = [8, 32], strides = [1, 1]} : vector<8x128xf32> to vector<8x32xf32>
    %305 = arith.negf %304 : vector<8x32xf32>
    %306 = math.exp %305 : vector<8x32xf32>
    %cst_86 = arith.constant 1.000000e+00 : f32
    %307 = vector.broadcast %cst_86 : f32 to vector<8x32xf32>
    %308 = arith.addf %307, %306 : vector<8x32xf32>
    %309 = arith.divf %307, %308 : vector<8x32xf32>
    %310 = arith.mulf %301, %283 : vector<8x32xf32>
    %311 = arith.mulf %295, %303 : vector<8x32xf32>
    %312 = arith.addf %310, %311 : vector<8x32xf32>
    %313 = math.tanh %312 : vector<8x32xf32>
    %314 = arith.mulf %309, %313 : vector<8x32xf32>
    %315 = arith.index_cast %285 : i32 to index
    %c0_87 = arith.constant 0 : index
    %316 = vector.load %arg10[%315, %c0_87] : memref<64x32xf32, #tpu.memory_space<vmem>>, vector<8x32xf32>
    tpu.vector_store %arg10[%315, %c0_87], %314 {strides = array<i32>} : memref<64x32xf32, #tpu.memory_space<vmem>>, vector<8x32xf32>,
    %c1_i32_88 = arith.constant 1 : i32
    %c8_i32_89 = arith.constant 8 : i32
    %317 = arith.muli %c1_i32_88, %c8_i32_89 : i32
    %318 = tpu.assume_multiple %317, 8 : i32
    %319 = arith.index_cast %318 : i32 to index
    %c0_90 = arith.constant 0 : index
    %320 = vector.load %arg11[%319, %c0_90] : memref<64x128xf32, #tpu.memory_space<vmem>>, vector<8x128xf32>
    %cst_91 = arith.constant dense<0.000000e+00> : vector<8x128xf32>
    %321 = tpu.matmul %314, %281, %cst_91 {dimension_numbers = #tpu.dot_dimension_numbers<[1], [0], [0], [1], [0, 0, 1, 1], [], []>} : vector<8x32xf32>, vector<32x128xf32>, vector<8x128xf32> -> vector<8x128xf32>
    %322 = arith.addf %320, %321 : vector<8x128xf32>
    %323 = vector.extract_strided_slice %322 {offsets = [0, 0], sizes = [8, 32], strides = [1, 1]} : vector<8x128xf32> to vector<8x32xf32>
    %324 = arith.negf %323 : vector<8x32xf32>
    %325 = math.exp %324 : vector<8x32xf32>
    %cst_92 = arith.constant 1.000000e+00 : f32
    %326 = vector.broadcast %cst_92 : f32 to vector<8x32xf32>
    %327 = arith.addf %326, %325 : vector<8x32xf32>
    %328 = arith.divf %326, %327 : vector<8x32xf32>
    %329 = vector.extract_strided_slice %322 {offsets = [0, 32], sizes = [8, 32], strides = [1, 1]} : vector<8x128xf32> to vector<8x32xf32>
    %330 = arith.negf %329 : vector<8x32xf32>
    %331 = math.exp %330 : vector<8x32xf32>
    %cst_93 = arith.constant 1.000000e+00 : f32
    %332 = vector.broadcast %cst_93 : f32 to vector<8x32xf32>
    %333 = arith.addf %332, %331 : vector<8x32xf32>
    %334 = arith.divf %332, %333 : vector<8x32xf32>
    %335 = vector.extract_strided_slice %322 {offsets = [0, 64], sizes = [8, 32], strides = [1, 1]} : vector<8x128xf32> to vector<8x32xf32>
    %336 = math.tanh %335 : vector<8x32xf32>
    %337 = vector.extract_strided_slice %322 {offsets = [0, 96], sizes = [8, 32], strides = [1, 1]} : vector<8x128xf32> to vector<8x32xf32>
    %338 = arith.negf %337 : vector<8x32xf32>
    %339 = math.exp %338 : vector<8x32xf32>
    %cst_94 = arith.constant 1.000000e+00 : f32
    %340 = vector.broadcast %cst_94 : f32 to vector<8x32xf32>
    %341 = arith.addf %340, %339 : vector<8x32xf32>
    %342 = arith.divf %340, %341 : vector<8x32xf32>
    %343 = arith.mulf %334, %312 : vector<8x32xf32>
    %344 = arith.mulf %328, %336 : vector<8x32xf32>
    %345 = arith.addf %343, %344 : vector<8x32xf32>
    %346 = math.tanh %345 : vector<8x32xf32>
    %347 = arith.mulf %342, %346 : vector<8x32xf32>
    %348 = arith.index_cast %318 : i32 to index
    %c0_95 = arith.constant 0 : index
    %349 = vector.load %arg10[%348, %c0_95] : memref<64x32xf32, #tpu.memory_space<vmem>>, vector<8x32xf32>
    tpu.vector_store %arg10[%348, %c0_95], %347 {strides = array<i32>} : memref<64x32xf32, #tpu.memory_space<vmem>>, vector<8x32xf32>,
    %c2_i32_96 = arith.constant 2 : i32
    %c8_i32_97 = arith.constant 8 : i32
    %350 = arith.muli %c2_i32_96, %c8_i32_97 : i32
    %351 = tpu.assume_multiple %350, 8 : i32
    %352 = arith.index_cast %351 : i32 to index
    %c0_98 = arith.constant 0 : index
    %353 = vector.load %arg11[%352, %c0_98] : memref<64x128xf32, #tpu.memory_space<vmem>>, vector<8x128xf32>
    %cst_99 = arith.constant dense<0.000000e+00> : vector<8x128xf32>
    %354 = tpu.matmul %347, %281, %cst_99 {dimension_numbers = #tpu.dot_dimension_numbers<[1], [0], [0], [1], [0, 0, 1, 1], [], []>} : vector<8x32xf32>, vector<32x128xf32>, vector<8x128xf32> -> vector<8x128xf32>
    %355 = arith.addf %353, %354 : vector<8x128xf32>
    %356 = vector.extract_strided_slice %355 {offsets = [0, 0], sizes = [8, 32], strides = [1, 1]} : vector<8x128xf32> to vector<8x32xf32>
    %357 = arith.negf %356 : vector<8x32xf32>
    %358 = math.exp %357 : vector<8x32xf32>
    %cst_100 = arith.constant 1.000000e+00 : f32
    %359 = vector.broadcast %cst_100 : f32 to vector<8x32xf32>
    %360 = arith.addf %359, %358 : vector<8x32xf32>
    %361 = arith.divf %359, %360 : vector<8x32xf32>
    %362 = vector.extract_strided_slice %355 {offsets = [0, 32], sizes = [8, 32], strides = [1, 1]} : vector<8x128xf32> to vector<8x32xf32>
    %363 = arith.negf %362 : vector<8x32xf32>
    %364 = math.exp %363 : vector<8x32xf32>
    %cst_101 = arith.constant 1.000000e+00 : f32
    %365 = vector.broadcast %cst_101 : f32 to vector<8x32xf32>
    %366 = arith.addf %365, %364 : vector<8x32xf32>
    %367 = arith.divf %365, %366 : vector<8x32xf32>
    %368 = vector.extract_strided_slice %355 {offsets = [0, 64], sizes = [8, 32], strides = [1, 1]} : vector<8x128xf32> to vector<8x32xf32>
    %369 = math.tanh %368 : vector<8x32xf32>
    %370 = vector.extract_strided_slice %355 {offsets = [0, 96], sizes = [8, 32], strides = [1, 1]} : vector<8x128xf32> to vector<8x32xf32>
    %371 = arith.negf %370 : vector<8x32xf32>
    %372 = math.exp %371 : vector<8x32xf32>
    %cst_102 = arith.constant 1.000000e+00 : f32
    %373 = vector.broadcast %cst_102 : f32 to vector<8x32xf32>
    %374 = arith.addf %373, %372 : vector<8x32xf32>
    %375 = arith.divf %373, %374 : vector<8x32xf32>
    %376 = arith.mulf %367, %345 : vector<8x32xf32>
    %377 = arith.mulf %361, %369 : vector<8x32xf32>
    %378 = arith.addf %376, %377 : vector<8x32xf32>
    %379 = math.tanh %378 : vector<8x32xf32>
    %380 = arith.mulf %375, %379 : vector<8x32xf32>
    %381 = arith.index_cast %351 : i32 to index
    %c0_103 = arith.constant 0 : index
    %382 = vector.load %arg10[%381, %c0_103] : memref<64x32xf32, #tpu.memory_space<vmem>>, vector<8x32xf32>
    tpu.vector_store %arg10[%381, %c0_103], %380 {strides = array<i32>} : memref<64x32xf32, #tpu.memory_space<vmem>>, vector<8x32xf32>,
    %c3_i32_104 = arith.constant 3 : i32
    %c8_i32_105 = arith.constant 8 : i32
    %383 = arith.muli %c3_i32_104, %c8_i32_105 : i32
    %384 = tpu.assume_multiple %383, 8 : i32
    %385 = arith.index_cast %384 : i32 to index
    %c0_106 = arith.constant 0 : index
    %386 = vector.load %arg11[%385, %c0_106] : memref<64x128xf32, #tpu.memory_space<vmem>>, vector<8x128xf32>
    %cst_107 = arith.constant dense<0.000000e+00> : vector<8x128xf32>
    %387 = tpu.matmul %380, %281, %cst_107 {dimension_numbers = #tpu.dot_dimension_numbers<[1], [0], [0], [1], [0, 0, 1, 1], [], []>} : vector<8x32xf32>, vector<32x128xf32>, vector<8x128xf32> -> vector<8x128xf32>
    %388 = arith.addf %386, %387 : vector<8x128xf32>
    %389 = vector.extract_strided_slice %388 {offsets = [0, 0], sizes = [8, 32], strides = [1, 1]} : vector<8x128xf32> to vector<8x32xf32>
    %390 = arith.negf %389 : vector<8x32xf32>
    %391 = math.exp %390 : vector<8x32xf32>
    %cst_108 = arith.constant 1.000000e+00 : f32
    %392 = vector.broadcast %cst_108 : f32 to vector<8x32xf32>
    %393 = arith.addf %392, %391 : vector<8x32xf32>
    %394 = arith.divf %392, %393 : vector<8x32xf32>
    %395 = vector.extract_strided_slice %388 {offsets = [0, 32], sizes = [8, 32], strides = [1, 1]} : vector<8x128xf32> to vector<8x32xf32>
    %396 = arith.negf %395 : vector<8x32xf32>
    %397 = math.exp %396 : vector<8x32xf32>
    %cst_109 = arith.constant 1.000000e+00 : f32
    %398 = vector.broadcast %cst_109 : f32 to vector<8x32xf32>
    %399 = arith.addf %398, %397 : vector<8x32xf32>
    %400 = arith.divf %398, %399 : vector<8x32xf32>
    %401 = vector.extract_strided_slice %388 {offsets = [0, 64], sizes = [8, 32], strides = [1, 1]} : vector<8x128xf32> to vector<8x32xf32>
    %402 = math.tanh %401 : vector<8x32xf32>
    %403 = vector.extract_strided_slice %388 {offsets = [0, 96], sizes = [8, 32], strides = [1, 1]} : vector<8x128xf32> to vector<8x32xf32>
    %404 = arith.negf %403 : vector<8x32xf32>
    %405 = math.exp %404 : vector<8x32xf32>
    %cst_110 = arith.constant 1.000000e+00 : f32
    %406 = vector.broadcast %cst_110 : f32 to vector<8x32xf32>
    %407 = arith.addf %406, %405 : vector<8x32xf32>
    %408 = arith.divf %406, %407 : vector<8x32xf32>
    %409 = arith.mulf %400, %378 : vector<8x32xf32>
    %410 = arith.mulf %394, %402 : vector<8x32xf32>
    %411 = arith.addf %409, %410 : vector<8x32xf32>
    %412 = math.tanh %411 : vector<8x32xf32>
    %413 = arith.mulf %408, %412 : vector<8x32xf32>
    %414 = arith.index_cast %384 : i32 to index
    %c0_111 = arith.constant 0 : index
    %415 = vector.load %arg10[%414, %c0_111] : memref<64x32xf32, #tpu.memory_space<vmem>>, vector<8x32xf32>
    tpu.vector_store %arg10[%414, %c0_111], %413 {strides = array<i32>} : memref<64x32xf32, #tpu.memory_space<vmem>>, vector<8x32xf32>,
    %c4_i32_112 = arith.constant 4 : i32
    %c8_i32_113 = arith.constant 8 : i32
    %416 = arith.muli %c4_i32_112, %c8_i32_113 : i32
    %417 = tpu.assume_multiple %416, 8 : i32
    %418 = arith.index_cast %417 : i32 to index
    %c0_114 = arith.constant 0 : index
    %419 = vector.load %arg11[%418, %c0_114] : memref<64x128xf32, #tpu.memory_space<vmem>>, vector<8x128xf32>
    %cst_115 = arith.constant dense<0.000000e+00> : vector<8x128xf32>
    %420 = tpu.matmul %413, %281, %cst_115 {dimension_numbers = #tpu.dot_dimension_numbers<[1], [0], [0], [1], [0, 0, 1, 1], [], []>} : vector<8x32xf32>, vector<32x128xf32>, vector<8x128xf32> -> vector<8x128xf32>
    %421 = arith.addf %419, %420 : vector<8x128xf32>
    %422 = vector.extract_strided_slice %421 {offsets = [0, 0], sizes = [8, 32], strides = [1, 1]} : vector<8x128xf32> to vector<8x32xf32>
    %423 = arith.negf %422 : vector<8x32xf32>
    %424 = math.exp %423 : vector<8x32xf32>
    %cst_116 = arith.constant 1.000000e+00 : f32
    %425 = vector.broadcast %cst_116 : f32 to vector<8x32xf32>
    %426 = arith.addf %425, %424 : vector<8x32xf32>
    %427 = arith.divf %425, %426 : vector<8x32xf32>
    %428 = vector.extract_strided_slice %421 {offsets = [0, 32], sizes = [8, 32], strides = [1, 1]} : vector<8x128xf32> to vector<8x32xf32>
    %429 = arith.negf %428 : vector<8x32xf32>
    %430 = math.exp %429 : vector<8x32xf32>
    %cst_117 = arith.constant 1.000000e+00 : f32
    %431 = vector.broadcast %cst_117 : f32 to vector<8x32xf32>
    %432 = arith.addf %431, %430 : vector<8x32xf32>
    %433 = arith.divf %431, %432 : vector<8x32xf32>
    %434 = vector.extract_strided_slice %421 {offsets = [0, 64], sizes = [8, 32], strides = [1, 1]} : vector<8x128xf32> to vector<8x32xf32>
    %435 = math.tanh %434 : vector<8x32xf32>
    %436 = vector.extract_strided_slice %421 {offsets = [0, 96], sizes = [8, 32], strides = [1, 1]} : vector<8x128xf32> to vector<8x32xf32>
    %437 = arith.negf %436 : vector<8x32xf32>
    %438 = math.exp %437 : vector<8x32xf32>
    %cst_118 = arith.constant 1.000000e+00 : f32
    %439 = vector.broadcast %cst_118 : f32 to vector<8x32xf32>
    %440 = arith.addf %439, %438 : vector<8x32xf32>
    %441 = arith.divf %439, %440 : vector<8x32xf32>
    %442 = arith.mulf %433, %411 : vector<8x32xf32>
    %443 = arith.mulf %427, %435 : vector<8x32xf32>
    %444 = arith.addf %442, %443 : vector<8x32xf32>
    %445 = math.tanh %444 : vector<8x32xf32>
    %446 = arith.mulf %441, %445 : vector<8x32xf32>
    %447 = arith.index_cast %417 : i32 to index
    %c0_119 = arith.constant 0 : index
    %448 = vector.load %arg10[%447, %c0_119] : memref<64x32xf32, #tpu.memory_space<vmem>>, vector<8x32xf32>
    tpu.vector_store %arg10[%447, %c0_119], %446 {strides = array<i32>} : memref<64x32xf32, #tpu.memory_space<vmem>>, vector<8x32xf32>,
    %c5_i32_120 = arith.constant 5 : i32
    %c8_i32_121 = arith.constant 8 : i32
    %449 = arith.muli %c5_i32_120, %c8_i32_121 : i32
    %450 = tpu.assume_multiple %449, 8 : i32
    %451 = arith.index_cast %450 : i32 to index
    %c0_122 = arith.constant 0 : index
    %452 = vector.load %arg11[%451, %c0_122] : memref<64x128xf32, #tpu.memory_space<vmem>>, vector<8x128xf32>
    %cst_123 = arith.constant dense<0.000000e+00> : vector<8x128xf32>
    %453 = tpu.matmul %446, %281, %cst_123 {dimension_numbers = #tpu.dot_dimension_numbers<[1], [0], [0], [1], [0, 0, 1, 1], [], []>} : vector<8x32xf32>, vector<32x128xf32>, vector<8x128xf32> -> vector<8x128xf32>
    %454 = arith.addf %452, %453 : vector<8x128xf32>
    %455 = vector.extract_strided_slice %454 {offsets = [0, 0], sizes = [8, 32], strides = [1, 1]} : vector<8x128xf32> to vector<8x32xf32>
    %456 = arith.negf %455 : vector<8x32xf32>
    %457 = math.exp %456 : vector<8x32xf32>
    %cst_124 = arith.constant 1.000000e+00 : f32
    %458 = vector.broadcast %cst_124 : f32 to vector<8x32xf32>
    %459 = arith.addf %458, %457 : vector<8x32xf32>
    %460 = arith.divf %458, %459 : vector<8x32xf32>
    %461 = vector.extract_strided_slice %454 {offsets = [0, 32], sizes = [8, 32], strides = [1, 1]} : vector<8x128xf32> to vector<8x32xf32>
    %462 = arith.negf %461 : vector<8x32xf32>
    %463 = math.exp %462 : vector<8x32xf32>
    %cst_125 = arith.constant 1.000000e+00 : f32
    %464 = vector.broadcast %cst_125 : f32 to vector<8x32xf32>
    %465 = arith.addf %464, %463 : vector<8x32xf32>
    %466 = arith.divf %464, %465 : vector<8x32xf32>
    %467 = vector.extract_strided_slice %454 {offsets = [0, 64], sizes = [8, 32], strides = [1, 1]} : vector<8x128xf32> to vector<8x32xf32>
    %468 = math.tanh %467 : vector<8x32xf32>
    %469 = vector.extract_strided_slice %454 {offsets = [0, 96], sizes = [8, 32], strides = [1, 1]} : vector<8x128xf32> to vector<8x32xf32>
    %470 = arith.negf %469 : vector<8x32xf32>
    %471 = math.exp %470 : vector<8x32xf32>
    %cst_126 = arith.constant 1.000000e+00 : f32
    %472 = vector.broadcast %cst_126 : f32 to vector<8x32xf32>
    %473 = arith.addf %472, %471 : vector<8x32xf32>
    %474 = arith.divf %472, %473 : vector<8x32xf32>
    %475 = arith.mulf %466, %444 : vector<8x32xf32>
    %476 = arith.mulf %460, %468 : vector<8x32xf32>
    %477 = arith.addf %475, %476 : vector<8x32xf32>
    %478 = math.tanh %477 : vector<8x32xf32>
    %479 = arith.mulf %474, %478 : vector<8x32xf32>
    %480 = arith.index_cast %450 : i32 to index
    %c0_127 = arith.constant 0 : index
    %481 = vector.load %arg10[%480, %c0_127] : memref<64x32xf32, #tpu.memory_space<vmem>>, vector<8x32xf32>
    tpu.vector_store %arg10[%480, %c0_127], %479 {strides = array<i32>} : memref<64x32xf32, #tpu.memory_space<vmem>>, vector<8x32xf32>,
    %c6_i32_128 = arith.constant 6 : i32
    %c8_i32_129 = arith.constant 8 : i32
    %482 = arith.muli %c6_i32_128, %c8_i32_129 : i32
    %483 = tpu.assume_multiple %482, 8 : i32
    %484 = arith.index_cast %483 : i32 to index
    %c0_130 = arith.constant 0 : index
    %485 = vector.load %arg11[%484, %c0_130] : memref<64x128xf32, #tpu.memory_space<vmem>>, vector<8x128xf32>
    %cst_131 = arith.constant dense<0.000000e+00> : vector<8x128xf32>
    %486 = tpu.matmul %479, %281, %cst_131 {dimension_numbers = #tpu.dot_dimension_numbers<[1], [0], [0], [1], [0, 0, 1, 1], [], []>} : vector<8x32xf32>, vector<32x128xf32>, vector<8x128xf32> -> vector<8x128xf32>
    %487 = arith.addf %485, %486 : vector<8x128xf32>
    %488 = vector.extract_strided_slice %487 {offsets = [0, 0], sizes = [8, 32], strides = [1, 1]} : vector<8x128xf32> to vector<8x32xf32>
    %489 = arith.negf %488 : vector<8x32xf32>
    %490 = math.exp %489 : vector<8x32xf32>
    %cst_132 = arith.constant 1.000000e+00 : f32
    %491 = vector.broadcast %cst_132 : f32 to vector<8x32xf32>
    %492 = arith.addf %491, %490 : vector<8x32xf32>
    %493 = arith.divf %491, %492 : vector<8x32xf32>
    %494 = vector.extract_strided_slice %487 {offsets = [0, 32], sizes = [8, 32], strides = [1, 1]} : vector<8x128xf32> to vector<8x32xf32>
    %495 = arith.negf %494 : vector<8x32xf32>
    %496 = math.exp %495 : vector<8x32xf32>
    %cst_133 = arith.constant 1.000000e+00 : f32
    %497 = vector.broadcast %cst_133 : f32 to vector<8x32xf32>
    %498 = arith.addf %497, %496 : vector<8x32xf32>
    %499 = arith.divf %497, %498 : vector<8x32xf32>
    %500 = vector.extract_strided_slice %487 {offsets = [0, 64], sizes = [8, 32], strides = [1, 1]} : vector<8x128xf32> to vector<8x32xf32>
    %501 = math.tanh %500 : vector<8x32xf32>
    %502 = vector.extract_strided_slice %487 {offsets = [0, 96], sizes = [8, 32], strides = [1, 1]} : vector<8x128xf32> to vector<8x32xf32>
    %503 = arith.negf %502 : vector<8x32xf32>
    %504 = math.exp %503 : vector<8x32xf32>
    %cst_134 = arith.constant 1.000000e+00 : f32
    %505 = vector.broadcast %cst_134 : f32 to vector<8x32xf32>
    %506 = arith.addf %505, %504 : vector<8x32xf32>
    %507 = arith.divf %505, %506 : vector<8x32xf32>
    %508 = arith.mulf %499, %477 : vector<8x32xf32>
    %509 = arith.mulf %493, %501 : vector<8x32xf32>
    %510 = arith.addf %508, %509 : vector<8x32xf32>
    %511 = math.tanh %510 : vector<8x32xf32>
    %512 = arith.mulf %507, %511 : vector<8x32xf32>
    %513 = arith.index_cast %483 : i32 to index
    %c0_135 = arith.constant 0 : index
    %514 = vector.load %arg10[%513, %c0_135] : memref<64x32xf32, #tpu.memory_space<vmem>>, vector<8x32xf32>
    tpu.vector_store %arg10[%513, %c0_135], %512 {strides = array<i32>} : memref<64x32xf32, #tpu.memory_space<vmem>>, vector<8x32xf32>,
    %c7_i32_136 = arith.constant 7 : i32
    %c8_i32_137 = arith.constant 8 : i32
    %515 = arith.muli %c7_i32_136, %c8_i32_137 : i32
    %516 = tpu.assume_multiple %515, 8 : i32
    %517 = arith.index_cast %516 : i32 to index
    %c0_138 = arith.constant 0 : index
    %518 = vector.load %arg11[%517, %c0_138] : memref<64x128xf32, #tpu.memory_space<vmem>>, vector<8x128xf32>
    %cst_139 = arith.constant dense<0.000000e+00> : vector<8x128xf32>
    %519 = tpu.matmul %512, %281, %cst_139 {dimension_numbers = #tpu.dot_dimension_numbers<[1], [0], [0], [1], [0, 0, 1, 1], [], []>} : vector<8x32xf32>, vector<32x128xf32>, vector<8x128xf32> -> vector<8x128xf32>
    %520 = arith.addf %518, %519 : vector<8x128xf32>
    %521 = vector.extract_strided_slice %520 {offsets = [0, 0], sizes = [8, 32], strides = [1, 1]} : vector<8x128xf32> to vector<8x32xf32>
    %522 = arith.negf %521 : vector<8x32xf32>
    %523 = math.exp %522 : vector<8x32xf32>
    %cst_140 = arith.constant 1.000000e+00 : f32
    %524 = vector.broadcast %cst_140 : f32 to vector<8x32xf32>
    %525 = arith.addf %524, %523 : vector<8x32xf32>
    %526 = arith.divf %524, %525 : vector<8x32xf32>
    %527 = vector.extract_strided_slice %520 {offsets = [0, 32], sizes = [8, 32], strides = [1, 1]} : vector<8x128xf32> to vector<8x32xf32>
    %528 = arith.negf %527 : vector<8x32xf32>
    %529 = math.exp %528 : vector<8x32xf32>
    %cst_141 = arith.constant 1.000000e+00 : f32
    %530 = vector.broadcast %cst_141 : f32 to vector<8x32xf32>
    %531 = arith.addf %530, %529 : vector<8x32xf32>
    %532 = arith.divf %530, %531 : vector<8x32xf32>
    %533 = vector.extract_strided_slice %520 {offsets = [0, 64], sizes = [8, 32], strides = [1, 1]} : vector<8x128xf32> to vector<8x32xf32>
    %534 = math.tanh %533 : vector<8x32xf32>
    %535 = vector.extract_strided_slice %520 {offsets = [0, 96], sizes = [8, 32], strides = [1, 1]} : vector<8x128xf32> to vector<8x32xf32>
    %536 = arith.negf %535 : vector<8x32xf32>
    %537 = math.exp %536 : vector<8x32xf32>
    %cst_142 = arith.constant 1.000000e+00 : f32
    %538 = vector.broadcast %cst_142 : f32 to vector<8x32xf32>
    %539 = arith.addf %538, %537 : vector<8x32xf32>
    %540 = arith.divf %538, %539 : vector<8x32xf32>
    %541 = arith.mulf %532, %510 : vector<8x32xf32>
    %542 = arith.mulf %526, %534 : vector<8x32xf32>
    %543 = arith.addf %541, %542 : vector<8x32xf32>
    %544 = math.tanh %543 : vector<8x32xf32>
    %545 = arith.mulf %540, %544 : vector<8x32xf32>
    %546 = arith.index_cast %516 : i32 to index
    %c0_143 = arith.constant 0 : index
    %547 = vector.load %arg10[%546, %c0_143] : memref<64x32xf32, #tpu.memory_space<vmem>>, vector<8x32xf32>
    tpu.vector_store %arg10[%546, %c0_143], %545 {strides = array<i32>} : memref<64x32xf32, #tpu.memory_space<vmem>>, vector<8x32xf32>,
    %c8_i32_144 = arith.constant 8 : i32
    %c56 = arith.constant 56 : index
    %c0_145 = arith.constant 0 : index
    %548 = vector.load %arg10[%c56, %c0_145] : memref<64x32xf32, #tpu.memory_space<vmem>>, vector<8x32xf32>
    %c0_146 = arith.constant 0 : index
    %c0_147 = arith.constant 0 : index
    %549 = vector.load %arg7[%c0_146, %c0_147] : memref<32x128xf32, #tpu.memory_space<vmem>>, vector<32x128xf32>
    %cst_148 = arith.constant dense<0.000000e+00> : vector<8x128xf32>
    %550 = tpu.matmul %548, %549, %cst_148 {dimension_numbers = #tpu.dot_dimension_numbers<[1], [0], [0], [1], [0, 0, 1, 1], [], []>} : vector<8x32xf32>, vector<32x128xf32>, vector<8x128xf32> -> vector<8x128xf32>
    %c0_149 = arith.constant 0 : index
    %c0_150 = arith.constant 0 : index
    %551 = vector.load %arg8[%c0_149, %c0_150] : memref<1x128xf32, #tpu.memory_space<vmem>>, vector<1x128xf32>
    %552 = vector.broadcast %551 : vector<1x128xf32> to vector<8x128xf32>
    %553 = arith.addf %550, %552 : vector<8x128xf32>
    %c0_151 = arith.constant 0 : index
    %c0_152 = arith.constant 0 : index
    %554 = vector.load %arg9[%c0_151, %c0_152] : memref<8x128xf32, #tpu.memory_space<vmem>>, vector<8x128xf32>
    tpu.vector_store %arg9[%c0_151, %c0_152], %553 {strides = array<i32>} : memref<8x128xf32, #tpu.memory_space<vmem>>, vector<8x128xf32>,
    return
  }
}

</mosaic_0001>

<bundles_post_ra>
// kernel: tpu_custom_call.1
= control target key start
LH: loop header
LB: loop body
LE: loop exit
PB: predicated region body
PF: predicated region fallthrough
CT: control target
= control target key end

     0   :  { %14 = vsyncpa [#allocation5], 0  ;;  %s3288_s0 = inlined_call_operand.vmem [shape: f32[64,8], index: 0, kind: input, shape index: {}]   ;;  %s3289_s1 = inlined_call_operand.hbm [shape: f32[8,128], index: 1, kind: input, shape index: {}]   ;;  %s3290_s2 = inlined_call_operand.vmem [shape: f32[32,128], index: 2, kind: input, shape index: {}]   ;;  %s3291_s3 = inlined_call_operand.vmem [shape: f32[1,128], index: 3, kind: input, shape index: {}]   ;;  %s3292_s4 = inlined_call_operand.vmem [shape: f32[32,128], index: 4, kind: input, shape index: {}]   ;;  %s3293_s5 = inlined_call_operand.hbm [shape: f32[32,128], index: 5, kind: input, shape index: {}]   ;;  %s3294_s6 = inlined_call_operand.vmem [shape: f32[1,128], index: 6, kind: input, shape index: {}]   ;;  %s3295_s7 = inlined_call_operand.vmem [shape: f32[32,128], index: 7, kind: input, shape index: {}]   ;;  %s3296_s8 = inlined_call_operand.vmem [shape: f32[1,128], index: 8, kind: input, shape index: {}]   ;;  %s3297_s9 = inlined_call_operand.hbm [shape: f32[8,128], index: 9, kind: output, shape index: {}]  }
   0x1   :  { %15 = vsyncpa [#allocation8], 0 }
   0x2   :  { %16 = vsyncpa [#allocation6], 0  ;;  %s2838_s30 = smov [#allocation4]   ;;  %s2839_s11 = smov [#allocation7]  }
   0x3   :  { %s25_s10 = sshll.u32 %s2838_s30, 4  ;;  %s40_s12 = sshll.u32 %s2839_s11, 4  ;;  %s26_s10 = int_to_ptr.vmem [resolvable:$true] %s25_s10  ;;  %s2898_s12 = int_to_ptr.vmem [resolvable:$true] %s40_s12 }
   0x4   :  { %s2766_s15 = scalar_lea.hbm %s3289_s1, 128 }
   0x5   :  { %p2767_p0 = scmp.ne.s32.totalorder %s3289_s1, %s2766_s15  ;;  %p2770_p1 = scmp.lt.u32.totalorder %s2766_s15, %s3289_s1 }
   0x7   :  { %p2772_p2 = pnand %p2770_p1, %p2767_p0 }
   0x9   :  { %2775 = shalt.err (!%p2772_p2)
}
   0xa   :  { %s2776_s20 = scalar_lea.vmem %s26_s10, 128  ;;  %p2781_p4 = scmp.lt.s32.totalorder %s26_s10, %s26_s10 }
   0xb   :  { %p2777_p3 = scmp.ne.s32.totalorder %s26_s10, %s2776_s20  ;;  %p2782_p5 = scmp.lt.s32.totalorder %s2776_s20, %s2776_s20 }
   0xd   :  { %p2783_p6 = por %p2782_p5, %p2781_p4 }
   0xf   :  { %p2784_p7 = pnand %p2783_p6, %p2777_p3 }
  0x11   :  { %2787 = shalt.err (!%p2784_p7)
}
  0x12   :  { %28 = dma.hbm_to_vmem [thread:$0]  %s3289_s1, 128, %s26_s10, [#allocation5]  }
  0x13   :  { %s2788_s25 = scalar_lea.hbm %s3293_s5, 512 }
  0x14   :  { %p2789_p8 = scmp.ne.s32.totalorder %s3293_s5, %s2788_s25  ;;  %p2792_p9 = scmp.lt.u32.totalorder %s2788_s25, %s3293_s5 }
  0x16   :  { %p2794_p10 = pnand %p2792_p9, %p2789_p8 }
  0x18   :  { %2797 = shalt.err (!%p2794_p10)
}
  0x19   :  { %s2798_s30 = scalar_lea.vmem %s2898_s12, 512  ;;  %p2803_p12 = scmp.lt.s32.totalorder %s2898_s12, %s2898_s12 }
  0x1a   :  { %p2799_p11 = scmp.ne.s32.totalorder %s2898_s12, %s2798_s30  ;;  %p2804_p13 = scmp.lt.s32.totalorder %s2798_s30, %s2798_s30 }
  0x1c   :  { %p2805_p0 = por %p2804_p13, %p2803_p12 }
  0x1e   :  { %p2806_p1 = pnand %p2805_p0, %p2799_p11 }
  0x20   :  { %2809 = shalt.err (!%p2806_p1)
}
  0x21   :  { %s2840_s1 = smov 128   ;;  %s2841_s10 = smov 8  }
  0x22   :  { %46 = dma.hbm_to_vmem [thread:$0]  %s3293_s5, 512, %s2898_s12, [#allocation8], %s2840_s1, %s2840_s1, %s2841_s10  }
  0x23   :  { %2832 = dma.done.wait [#allocation5], 128  }
  0x24   :  { %2833 = vsyncadd [#allocation5], 4294967168 }
  0x25   :  { %2834 = dma.done.wait [#allocation8], 512  }
  0x26   :  { %2835 = vsyncadd [#allocation8], 4294966784  ;;  %v2842_v0 = vmov 0.0|0.0   ;;  %vm2843_vm0 = vmmov 0   ;;  %v2844_v1 = vmov 0.0   ;;  %vm75_vm1 = vcmask 64512  }
  0x27   :  { %2518 = vmatprep.subr.bf16.mxu1 %v2842_v0  ;;  %2319 = vmatprep.mubr.msk.f32.mxu1 %vm2843_vm0, %v2844_v1  ;;  %v213_v2 = vld [vmem:[%s3290_s2] sm:$0xff]  ;;  %v214_v3 = vld [vmem:[%s3290_s2 + $0x8] sm:$0xff]  ;;  %v215_v8 = vld [vmem:[%s3290_s2 + $0x10] sm:$0xff]  ;;  %s2845_s25 = smov 64   ;;  %vm218_vm2 = vcmask 261120  }
  0x28   :  { %v67_v4 = vld [vmem:[#allocation4] sm:$0xff]  ;;  %v2938_v5 = vpack.c.bf16 %v214_v3, %v213_v2  ;;  %v60_v7 = vld [vmem:[%s3288_s0 + $0x8] sm:$0xff]  ;;  %v216_v9 = vld [vmem:[%s3290_s2 + $0x18] sm:$0xff] }
  0x29   :  { %2297 = vmatprep.subr.mxu0 %v67_v4  ;;  %v59_v6 = vld [vmem:[%s3288_s0] sm:$0xff]  ;;  %v2955_v10 = vpack.c.bf16 %v216_v9, %v215_v8  ;;  %v61_v46 = vld [vmem:[%s3288_s0 + $0x10] sm:$0xff]  ;;  %v62_v47 = vld [vmem:[%s3288_s0 + $0x18] sm:$0xff] }
  0x2a   :  { %2298 = vmatpush3.msra.mxu0 %v67_v4  ;;  %2299 = vmatprep.mubr.msk.f32.mxu0 %vm75_vm1, %v59_v6  ;;  %v2975_v12 = vld [vmem:[%s3291_s3] ss:$0 sm:$0xff]  ;;  %s2846_s3 = smov 32   ;;  %v64_v49 = vld [vmem:[%s3288_s0 + $0x28] sm:$0xff]  ;;  %v65_v50 = vld [vmem:[%s3288_s0 + $0x30] sm:$0xff] }
  0x2b   :  { %2520 = vmatpush3.bf16.msra.mxu1 %v2938_v5  ;;  %2300 = vmatmul.mubr.msk.f32.vlgmr.msra.gmra.mrb[0].mxu0 %vm75_vm1, %v60_v7  ;;  %v63_v48 = vld [vmem:[%s3288_s0 + $0x20] sm:$0xff]  ;;  %v66_v51 = vld [vmem:[%s3288_s0 + $0x38] sm:$0xff] }
  0x2c   :  { %2521 = vmatprep.subr.bf16.mxu1 %v2842_v0  ;;  %2530 = vmatprep.subr.bf16.mxu0 %v2842_v0 }
  0x2d   :  { %2532 = vmatpush3.bf16.msra.mxu0 %v2938_v5  ;;  %2302 = vmatprep.mubr.msk.f32.mxu0 %vm75_vm1, %v61_v46 }
  0x2e   :  { %2533 = vmatprep.subr.bf16.mxu0 %v2842_v0 }
  0x2f   :  { %2523 = vmatpush3.bf16.msra.mxu1 %v2955_v10  ;;  %2303 = vmatmul.mubr.msk.f32.gmra.mrb[2].mxu0 %vm75_vm1, %v62_v47 }
  0x30   :  { %2524 = vmatprep.subr.bf16.mxu1 %v2842_v0  ;;  %2305 = vmatprep.mubr.msk.f32.mxu0 %vm75_vm1, %v63_v48 }
  0x31   :  { %2535 = vmatpush3.bf16.msra.mxu0 %v2955_v10 }
  0x32   :  { %2320 = vmatmul.mubr.f32.vlgmr.msra.gmra.mrb[0].mxu1 %v2844_v1  ;;  %2542 = vmatprep.subr.bf16.mxu0 %v2842_v0 }
  0x33   :  { %2526 = vmatpush3.bf16.msra.mxu1 %v2938_v5  ;;  %2330 = vmatprep.mubr.msk.f32.mxu1 %vm2843_vm0, %v2844_v1 }
  0x34   :  { %2527 = vmatprep.subr.bf16.mxu1 %v2842_v0  ;;  %2306 = vmatmul.mubr.msk.f32.gmra.mrb[4].mxu0 %vm75_vm1, %v64_v49 }
  0x35   :  { %2308 = vmatprep.mubr.msk.f32.mxu0 %vm75_vm1, %v65_v50 }
  0x37   :  { %2529 = vmatpush3.bf16.msra.mxu1 %v2955_v10 }
  0x38   :  { %2536 = vmatprep.subr.bf16.mxu1 %v2842_v0  ;;  %2309 = vmatmul.mubr.msk.f32.gmra.mrb[6].mxu0 %vm75_vm1, %v66_v51 }
  0x39   :  { %2341 = vmatprep.mubr.msk.f32.mxu0 %vm2843_vm0, %v2844_v1 }
  0xfe   :  { %v2301_v11 = vpop.f32.mrb[0].mxu0 }
  0xff   :  { %v166_v13 = vpop.f32.mrb[1].mxu0  ;;  %v172_v32 = vadd.f32 %v2301_v11, %v2975_v12 }
 0x100   :  { %v167_v14 = vadd.f32 %v2975_v12, %v166_v13 }
 0x102   :  { %v2304_v55 = vpop.f32.mrb[2].mxu0 }
 0x103   :  { %v176_v56 = vpop.f32.mrb[3].mxu0 }
 0x104   :  { %v177_v62 = vadd.f32 %v2975_v12, %v176_v56 }
 0x105   :  { %v288_v15 = vpop.f32.mrb[0].mxu1 }
 0x106   :  { %v292_v16 = vadd.f32 %v288_v15, %v167_v14  ;;  %v2321_v17 = vpop.f32.mrb[1].mxu1 }
 0x107   :  { %v3021_v57 = vpop.f32.mrb[4].mxu0 }
 0x108   :  { %2638 = vtanh.f32 %v292_v16  ;;  %v2150_v19 = vmul.f32 -1.442695, %v292_v16  ;;  %v3023_v58 = vpop.f32.mrb[5].mxu0 }
 0x10a   :  { %2640 = vpow2.f32 %v2150_v19 }
 0x10b   :  { %v3025_v59 = vpop.f32.mrb[6].mxu0 }
 0x10c   :  { %v3027_v60 = vpop.f32.mrb[7].mxu0 }
 0x112   :  { %v2639_v18 = vpop.eup %2638 }
 0x113   :  { %302 = vrot.lane.b32.xlu0 %v2639_v18, %s2845_s25 }
 0x114   :  { %v2641_v20 = vpop.eup %2640 }
 0x115   :  { %v296_v21 = vadd.f32 1.0, %v2641_v20 }
 0x117   :  { %2642 = vrcp.f32 %v296_v21  ;;  %v182_v21 = vadd.f32 %v2304_v55, %v2975_v12 }
 0x121   :  { %v2643_v22 = vpop.eup %2642 }
 0x122   :  { %v300_v25 = vmul.f32 0.0, %v2643_v22 }
 0x185   :  { %v303_v23 = vpop.permute.xlu0 %302 }
 0x186   :  { %v305_v24 = vmul.f32 %v2643_v22, %v303_v23 }
 0x188   :  { %307 = vrot.lane.b32.xlu0 %v305_v24, %s2846_s3 }
 0x1fa   :  { %v308_v26 = vpop.permute.xlu0 %307 }
 0x1fb   :  { %v310_v27 = vadd.f32 %v308_v26, %v300_v25 }
 0x1fd   :  { %2644 = vtanh.f32 %v310_v27 }
 0x207   :  { %v2645_v28 = vpop.eup %2644 }
 0x208   :  { %313 = vrot.lane.b32.xlu1 %v2645_v28, %s2845_s25 }
 0x27a   :  { %v314_v29 = vpop.permute.xlu1 %313 }
 0x27b   :  { %v316_v30 = vmul.f32 %v2643_v22, %v314_v29 }
 0x27d   :  { %318 = vrot.lane.b32.xlu1 %v316_v30, %s2846_s3 }
 0x2ef   :  { %v319_v31 = vpop.permute.xlu1 %318 }
 0x2f0   :  { %321 = vst.msk [vmem:[#allocation2] sm:$0xff] %vm218_vm2, %v319_v31  ;;  %2331 = vmatmul.mubr.msk.f32.vlgmr.msra.gmra.mrb[2].mxu1 %vm218_vm2, %v319_v31 }
 0x2f1   :  { %2538 = vmatpush3.bf16.msra.mxu1 %v2938_v5  ;;  %2352 = vmatprep.mubr.msk.f32.mxu1 %vm2843_vm0, %v2844_v1 }
 0x2f2   :  { %2539 = vmatprep.subr.bf16.mxu1 %v2842_v0 }
 0x2f5   :  { %2541 = vmatpush3.bf16.msra.mxu1 %v2955_v10 }
 0x2f6   :  { %2548 = vmatprep.subr.bf16.mxu1 %v2842_v0 }
 0x3c3   :  { %v392_v33 = vpop.f32.mrb[2].mxu1 }
 0x3c4   :  { %v396_v34 = vadd.f32 %v392_v33, %v172_v32  ;;  %v2332_v35 = vpop.f32.mrb[3].mxu1 }
 0x3c6   :  { %2646 = vtanh.f32 %v396_v34  ;;  %v2152_v37 = vmul.f32 -1.442695, %v396_v34 }
 0x3c8   :  { %2648 = vpow2.f32 %v2152_v37 }
 0x3d0   :  { %v2647_v36 = vpop.eup %2646 }
 0x3d1   :  { %406 = vrot.lane.b32.xlu0 %v2647_v36, %s2845_s25 }
 0x3d2   :  { %v2649_v38 = vpop.eup %2648 }
 0x3d3   :  { %v400_v39 = vadd.f32 1.0, %v2649_v38 }
 0x3d5   :  { %2650 = vrcp.f32 %v400_v39  ;;  %v187_v39 = vadd.f32 %v2975_v12, %v3023_v58  ;;  %v192_v58 = vadd.f32 %v3021_v57, %v2975_v12 }
 0x3df   :  { %v2651_v40 = vpop.eup %2650 }
 0x3e0   :  { %v404_v43 = vmul.f32 %v2651_v40, %v310_v27 }
 0x443   :  { %v407_v41 = vpop.permute.xlu0 %406 }
 0x444   :  { %v409_v42 = vmul.f32 %v2651_v40, %v407_v41 }
 0x446   :  { %411 = vrot.lane.b32.xlu1 %v409_v42, %s2846_s3 }
 0x4b8   :  { %v412_v44 = vpop.permute.xlu1 %411 }
 0x4b9   :  { %v414_v45 = vadd.f32 %v412_v44, %v404_v43 }
 0x4bb   :  { %2652 = vtanh.f32 %v414_v45 }
 0x4c5   :  { %v2653_v52 = vpop.eup %2652 }
 0x4c6   :  { %417 = vrot.lane.b32.xlu0 %v2653_v52, %s2845_s25 }
 0x538   :  { %v418_v53 = vpop.permute.xlu0 %417 }
 0x539   :  { %v420_v54 = vmul.f32 %v2651_v40, %v418_v53 }
 0x53b   :  { %422 = vrot.lane.b32.xlu1 %v420_v54, %s2846_s3 }
 0x5ad   :  { %v423_v61 = vpop.permute.xlu1 %422 }
 0x5ae   :  { %426 = vst.msk [vmem:[#allocation2 + $0x8] sm:$0xff] %vm218_vm2, %v423_v61  ;;  %2342 = vmatmul.mubr.msk.f32.vlgmr.msra.gmra.mrb[8].mxu0 %vm218_vm2, %v423_v61 }
 0x5af   :  { %2544 = vmatpush3.bf16.msra.mxu0 %v2938_v5  ;;  %2363 = vmatprep.mubr.msk.f32.mxu0 %vm2843_vm0, %v2844_v1 }
 0x5b0   :  { %2545 = vmatprep.subr.bf16.mxu0 %v2842_v0 }
 0x5b3   :  { %2547 = vmatpush3.bf16.msra.mxu0 %v2955_v10 }
 0x5b4   :  { %2554 = vmatprep.subr.bf16.mxu0 %v2842_v0 }
 0x681   :  { %v497_v63 = vpop.f32.mrb[8].mxu0 }
 0x682   :  { %v501_v2 = vadd.f32 %v497_v63, %v177_v62  ;;  %v2343_v3 = vpop.f32.mrb[9].mxu0 }
 0x684   :  { %2654 = vtanh.f32 %v501_v2  ;;  %v2154_v6 = vmul.f32 -1.442695, %v501_v2 }
 0x686   :  { %2656 = vpow2.f32 %v2154_v6 }
 0x68e   :  { %v2655_v4 = vpop.eup %2654 }
 0x68f   :  { %511 = vrot.lane.b32.xlu0 %v2655_v4, %s2845_s25 }
 0x690   :  { %v2657_v7 = vpop.eup %2656 }
 0x691   :  { %v505_v8 = vadd.f32 1.0, %v2657_v7 }
 0x693   :  { %2658 = vrcp.f32 %v505_v8 }
 0x69d   :  { %v2659_v9 = vpop.eup %2658 }
 0x69e   :  { %v509_v14 = vmul.f32 %v2659_v9, %v414_v45 }
 0x701   :  { %v512_v11 = vpop.permute.xlu0 %511 }
 0x702   :  { %v514_v13 = vmul.f32 %v2659_v9, %v512_v11  ;;  %v1065_v11 = vld [vmem:[%s3292_s4] sm:$0xff] }
 0x704   :  { %516 = vrot.lane.b32.xlu1 %v514_v13, %s2846_s3  ;;  %v1066_v13 = vld [vmem:[%s3292_s4 + $0x8] sm:$0xff] }
 0x776   :  { %v517_v15 = vpop.permute.xlu1 %516 }
 0x777   :  { %v519_v16 = vadd.f32 %v517_v15, %v509_v14  ;;  %v2566_v14 = vpack.c.bf16 %v1066_v13, %v1065_v11 }
 0x779   :  { %2660 = vtanh.f32 %v519_v16 }
 0x783   :  { %v2661_v17 = vpop.eup %2660 }
 0x784   :  { %522 = vrot.lane.b32.xlu0 %v2661_v17, %s2845_s25 }
 0x7f6   :  { %v523_v18 = vpop.permute.xlu0 %522 }
 0x7f7   :  { %v525_v19 = vmul.f32 %v2659_v9, %v523_v18  ;;  %v1067_v18 = vld [vmem:[%s3292_s4 + $0x10] sm:$0xff] }
 0x7f9   :  { %527 = vrot.lane.b32.xlu1 %v525_v19, %s2846_s3  ;;  %v1068_v19 = vld [vmem:[%s3292_s4 + $0x18] sm:$0xff] }
 0x86b   :  { %v528_v20 = vpop.permute.xlu1 %527 }
 0x86c   :  { %531 = vst.msk [vmem:[#allocation2 + $0x10] sm:$0xff] %vm218_vm2, %v528_v20  ;;  %2353 = vmatmul.mubr.msk.f32.vlgmr.msra.gmra.mrb[4].mxu1 %vm218_vm2, %v528_v20  ;;  %v2570_v20 = vpack.c.bf16 %v1068_v19, %v1067_v18 }
 0x86d   :  { %2550 = vmatpush3.bf16.msra.mxu1 %v2938_v5  ;;  %2374 = vmatprep.mubr.msk.f32.mxu1 %vm2843_vm0, %v2844_v1 }
 0x86e   :  { %2551 = vmatprep.subr.bf16.mxu1 %v2842_v0 }
 0x871   :  { %2553 = vmatpush3.bf16.msra.mxu1 %v2955_v10 }
 0x872   :  { %2560 = vmatprep.subr.bf16.mxu1 %v2842_v0 }
 0x93f   :  { %v602_v22 = vpop.f32.mrb[4].mxu1 }
 0x940   :  { %v606_v23 = vadd.f32 %v602_v22, %v182_v21  ;;  %v2354_v24 = vpop.f32.mrb[5].mxu1  ;;  %v1057_v22 = vld [vmem:[#allocation2] sm:$0xff] }
 0x941   :  { %v1059_v24 = vld [vmem:[#allocation2 + $0x10] sm:$0xff] }
 0x942   :  { %2662 = vtanh.f32 %v606_v23  ;;  %v2156_v26 = vmul.f32 -1.442695, %v606_v23  ;;  %v1058_v23 = vld [vmem:[#allocation2 + $0x8] sm:$0xff] }
 0x944   :  { %2664 = vpow2.f32 %v2156_v26 }
 0x94c   :  { %v2663_v25 = vpop.eup %2662 }
 0x94d   :  { %616 = vrot.lane.b32.xlu0 %v2663_v25, %s2845_s25 }
 0x94e   :  { %v2665_v27 = vpop.eup %2664 }
 0x94f   :  { %v610_v28 = vadd.f32 1.0, %v2665_v27 }
 0x951   :  { %2666 = vrcp.f32 %v610_v28  ;;  %v197_v28 = vadd.f32 %v2975_v12, %v3027_v60 }
 0x95b   :  { %v2667_v29 = vpop.eup %2666 }
 0x95c   :  { %v614_v32 = vmul.f32 %v2667_v29, %v519_v16 }
 0x9bf   :  { %v617_v30 = vpop.permute.xlu0 %616 }
 0x9c0   :  { %v619_v31 = vmul.f32 %v2667_v29, %v617_v30 }
 0x9c2   :  { %621 = vrot.lane.b32.xlu1 %v619_v31, %s2846_s3 }
 0xa34   :  { %v622_v33 = vpop.permute.xlu1 %621 }
 0xa35   :  { %v624_v34 = vadd.f32 %v622_v33, %v614_v32 }
 0xa37   :  { %2668 = vtanh.f32 %v624_v34 }
 0xa41   :  { %v2669_v35 = vpop.eup %2668 }
 0xa42   :  { %627 = vrot.lane.b32.xlu0 %v2669_v35, %s2845_s25 }
 0xab4   :  { %v628_v36 = vpop.permute.xlu0 %627 }
 0xab5   :  { %v630_v37 = vmul.f32 %v2667_v29, %v628_v36 }
 0xab7   :  { %632 = vrot.lane.b32.xlu1 %v630_v37, %s2846_s3 }
 0xb29   :  { %v633_v38 = vpop.permute.xlu1 %632 }
 0xb2a   :  { %636 = vst.msk [vmem:[#allocation2 + $0x18] sm:$0xff] %vm218_vm2, %v633_v38  ;;  %2364 = vmatmul.mubr.msk.f32.vlgmr.msra.gmra.mrb[10].mxu0 %vm218_vm2, %v633_v38 }
 0xb2b   :  { %2556 = vmatpush3.bf16.msra.mxu0 %v2938_v5  ;;  %2385 = vmatprep.mubr.msk.f32.mxu0 %vm2843_vm0, %v2844_v1 }
 0xb2c   :  { %2557 = vmatprep.subr.bf16.mxu0 %v2842_v0 }
 0xb2f   :  { %2559 = vmatpush3.bf16.msra.mxu0 %v2955_v10 }
 0xb30   :  { %2567 = vmatprep.subr.bf16.mxu0 %v2566_v14 }
 0xb31   :  { %v1060_v25 = vld [vmem:[#allocation2 + $0x18] sm:$0xff] }
 0xbfd   :  { %v707_v40 = vpop.f32.mrb[10].mxu0 }
 0xbfe   :  { %v711_v41 = vadd.f32 %v707_v40, %v187_v39  ;;  %v2365_v42 = vpop.f32.mrb[11].mxu0 }
 0xc00   :  { %2670 = vtanh.f32 %v711_v41  ;;  %v2158_v44 = vmul.f32 -1.442695, %v711_v41 }
 0xc02   :  { %2672 = vpow2.f32 %v2158_v44 }
 0xc0a   :  { %v2671_v43 = vpop.eup %2670 }
 0xc0b   :  { %721 = vrot.lane.b32.xlu0 %v2671_v43, %s2845_s25 }
 0xc0c   :  { %v2673_v45 = vpop.eup %2672 }
 0xc0d   :  { %v715_v46 = vadd.f32 1.0, %v2673_v45 }
 0xc0f   :  { %2674 = vrcp.f32 %v715_v46 }
 0xc19   :  { %v2675_v47 = vpop.eup %2674 }
 0xc1a   :  { %v719_v50 = vmul.f32 %v2675_v47, %v624_v34 }
 0xc7d   :  { %v722_v48 = vpop.permute.xlu0 %721 }
 0xc7e   :  { %v724_v49 = vmul.f32 %v2675_v47, %v722_v48  ;;  %v1213_v48 = vld [vmem:[#allocation7] sm:$0xff] }
 0xc80   :  { %726 = vrot.lane.b32.xlu1 %v724_v49, %s2846_s3  ;;  %v1214_v49 = vld [vmem:[#allocation7 + $0x8] sm:$0xff] }
 0xcf2   :  { %v727_v51 = vpop.permute.xlu1 %726 }
 0xcf3   :  { %v729_v52 = vadd.f32 %v727_v51, %v719_v50  ;;  %v3121_v50 = vpack.c.bf16 %v1214_v49, %v1213_v48  ;;  %v1215_v51 = vld [vmem:[#allocation7 + $0x10] sm:$0xff] }
 0xcf5   :  { %2676 = vtanh.f32 %v729_v52 }
 0xcff   :  { %v2677_v53 = vpop.eup %2676 }
 0xd00   :  { %732 = vrot.lane.b32.xlu0 %v2677_v53, %s2845_s25 }
 0xd72   :  { %v733_v54 = vpop.permute.xlu0 %732 }
 0xd73   :  { %v735_v55 = vmul.f32 %v2675_v47, %v733_v54 }
 0xd75   :  { %737 = vrot.lane.b32.xlu1 %v735_v55, %s2846_s3 }
 0xde7   :  { %v738_v56 = vpop.permute.xlu1 %737 }
 0xde8   :  { %741 = vst.msk [vmem:[#allocation2 + $0x20] sm:$0xff] %vm218_vm2, %v738_v56  ;;  %2375 = vmatmul.mubr.msk.f32.vlgmr.msra.gmra.mrb[6].mxu1 %vm218_vm2, %v738_v56 }
 0xde9   :  { %2562 = vmatpush3.bf16.msra.mxu1 %v2938_v5  ;;  %2396 = vmatprep.mubr.msk.f32.mxu1 %vm2843_vm0, %v2844_v1 }
 0xdea   :  { %2563 = vmatprep.subr.bf16.mxu1 %v2842_v0 }
 0xded   :  { %2565 = vmatpush3.bf16.msra.mxu1 %v2955_v10 }
 0xdee   :  { %2574 = vmatprep.subr.bf16.mxu1 %v2842_v0 }
 0xdef   :  { %v1061_v26 = vld [vmem:[#allocation2 + $0x20] sm:$0xff] }
 0xebb   :  { %v812_v61 = vpop.f32.mrb[6].mxu1 }
 0xebc   :  { %v816_v62 = vadd.f32 %v812_v61, %v192_v58  ;;  %v2376_v63 = vpop.f32.mrb[7].mxu1  ;;  %v202_v61 = vadd.f32 %v3025_v59, %v2975_v12 }
 0xebe   :  { %2678 = vtanh.f32 %v816_v62  ;;  %v2160_v5 = vmul.f32 -1.442695, %v816_v62 }
 0xec0   :  { %2680 = vpow2.f32 %v2160_v5  ;;  %v3151_v5 = vld [vmem:[%s3294_s6] ss:$0 sm:$0xff] }
 0xec8   :  { %v2679_v2 = vpop.eup %2678 }
 0xec9   :  { %826 = vrot.lane.b32.xlu0 %v2679_v2, %s2845_s25 }
 0xeca   :  { %v2681_v3 = vpop.eup %2680 }
 0xecb   :  { %v820_v4 = vadd.f32 1.0, %v2681_v3 }
 0xecd   :  { %2682 = vrcp.f32 %v820_v4 }
 0xed7   :  { %v2683_v6 = vpop.eup %2682 }
 0xed8   :  { %v824_v8 = vmul.f32 %v2683_v6, %v729_v52  ;;  %v1216_v52 = vld [vmem:[#allocation7 + $0x18] sm:$0xff] }
 0xed9   :  { %v3125_v53 = vpack.c.bf16 %v1216_v52, %v1215_v51 }
 0xf3b   :  { %v827_v7 = vpop.permute.xlu0 %826 }
 0xf3c   :  { %v829_v10 = vmul.f32 %v2683_v6, %v827_v7 }
 0xf3e   :  { %831 = vrot.lane.b32.xlu1 %v829_v10, %s2846_s3 }
 0xfb0   :  { %v832_v9 = vpop.permute.xlu1 %831 }
 0xfb1   :  { %v834_v57 = vadd.f32 %v832_v9, %v824_v8 }
 0xfb3   :  { %2684 = vtanh.f32 %v834_v57 }
 0xfbd   :  { %v2685_v15 = vpop.eup %2684 }
 0xfbe   :  { %837 = vrot.lane.b32.xlu0 %v2685_v15, %s2845_s25 }
0x1030   :  { %v838_v16 = vpop.permute.xlu0 %837 }
0x1031   :  { %v840_v17 = vmul.f32 %v2683_v6, %v838_v16 }
0x1033   :  { %842 = vrot.lane.b32.xlu1 %v840_v17, %s2846_s3 }
0x10a5   :  { %v843_v21 = vpop.permute.xlu1 %842 }
0x10a6   :  { %846 = vst.msk [vmem:[#allocation2 + $0x28] sm:$0xff] %vm218_vm2, %v843_v21  ;;  %2386 = vmatmul.mubr.msk.f32.vlgmr.msra.gmra.mrb[12].mxu0 %vm218_vm2, %v843_v21 }
0x10a7   :  { %2569 = vmatpush3.bf16.msra.mxu0 %v2566_v14  ;;  %2407 = vmatprep.mubr.msk.f32.mxu0 %vm218_vm2, %v1057_v22 }
0x10a8   :  { %2571 = vmatprep.subr.bf16.mxu0 %v2570_v20 }
0x10ab   :  { %2573 = vmatpush3.bf16.msra.mxu0 %v2570_v20 }
0x10ac   :  { %2586 = vmatprep.subr.bf16.mxu0 %v2842_v0 }
0x10ad   :  { %v1062_v27 = vld [vmem:[#allocation2 + $0x28] sm:$0xff] }
0x10ae   :  { %2408 = vmatmul.mubr.msk.f32.vlgmr.msra.gmra.mrb[14].mxu0 %vm218_vm2, %v1058_v23 }
0x10af   :  { %2410 = vmatprep.mubr.msk.f32.mxu0 %vm218_vm2, %v1059_v24  ;;  %2588 = vmatpush3.bf16.msra.mxu0 %v3121_v50 }
0x10b0   :  { %2589 = vmatprep.subr.bf16.mxu0 %v2842_v0 }
0x10b2   :  { %2411 = vmatmul.mubr.msk.f32.gmra.mrb[16].mxu0 %vm218_vm2, %v1060_v25 }
0x10b3   :  { %2413 = vmatprep.mubr.msk.f32.mxu0 %vm218_vm2, %v1061_v26  ;;  %2591 = vmatpush3.bf16.msra.mxu0 %v3125_v53 }
0x10b4   :  { %2598 = vmatprep.subr.bf16.mxu0 %v2842_v0 }
0x10b6   :  { %2414 = vmatmul.mubr.msk.f32.gmra.mrb[18].mxu0 %vm218_vm2, %v1062_v27 }
0x1179   :  { %v917_v29 = vpop.f32.mrb[12].mxu0 }
0x117a   :  { %v921_v30 = vadd.f32 %v917_v29, %v197_v28  ;;  %v2387_v31 = vpop.f32.mrb[13].mxu0 }
0x117c   :  { %2686 = vtanh.f32 %v921_v30  ;;  %v2162_v39 = vmul.f32 -1.442695, %v921_v30 }
0x117e   :  { %2688 = vpow2.f32 %v2162_v39 }
0x1181   :  { %v3105_v32 = vpop.f32.mrb[14].mxu0 }
0x1182   :  { %v1166_v33 = vpop.f32.mrb[15].mxu0 }
0x1183   :  { %v1167_v3 = vadd.f32 %v3151_v5, %v1166_v33 }
0x1185   :  { %v3107_v34 = vpop.f32.mrb[16].mxu0 }
0x1186   :  { %v2687_v35 = vpop.eup %2686  ;;  %v3109_v36 = vpop.f32.mrb[17].mxu0 }
0x1187   :  { %931 = vrot.lane.b32.xlu0 %v2687_v35, %s2845_s25  ;;  %v1172_v35 = vadd.f32 %v3105_v32, %v3151_v5 }
0x1188   :  { %v2689_v60 = vpop.eup %2688 }
0x1189   :  { %v3112_v37 = vpop.f32.mrb[18].mxu0  ;;  %v925_v40 = vadd.f32 1.0, %v2689_v60 }
0x118a   :  { %v3114_v38 = vpop.f32.mrb[19].mxu0 }
0x118b   :  { %2690 = vrcp.f32 %v925_v40 }
0x1195   :  { %v2691_v41 = vpop.eup %2690 }
0x1196   :  { %v929_v44 = vmul.f32 %v2691_v41, %v834_v57 }
0x11f9   :  { %v932_v42 = vpop.permute.xlu0 %931 }
0x11fa   :  { %v934_v43 = vmul.f32 %v2691_v41, %v932_v42 }
0x11fc   :  { %936 = vrot.lane.b32.xlu1 %v934_v43, %s2846_s3 }
0x126e   :  { %v937_v45 = vpop.permute.xlu1 %936 }
0x126f   :  { %v3117_v46 = vadd.f32 %v937_v45, %v929_v44 }
0x1271   :  { %2692 = vtanh.f32 %v3117_v46 }
0x127b   :  { %v2693_v47 = vpop.eup %2692 }
0x127c   :  { %942 = vrot.lane.b32.xlu0 %v2693_v47, %s2845_s25 }
0x12ee   :  { %v943_v54 = vpop.permute.xlu0 %942 }
0x12ef   :  { %v945_v55 = vmul.f32 %v2691_v41, %v943_v54 }
0x12f1   :  { %947 = vrot.lane.b32.xlu1 %v945_v55, %s2846_s3 }
0x1363   :  { %v948_v56 = vpop.permute.xlu1 %947 }
0x1364   :  { %951 = vst.msk [vmem:[#allocation2 + $0x30] sm:$0xff] %vm218_vm2, %v948_v56  ;;  %2397 = vmatmul.mubr.msk.f32.vlgmr.msra.gmra.mrb[8].mxu1 %vm218_vm2, %v948_v56 }
0x1365   :  { %2576 = vmatpush3.bf16.msra.mxu1 %v3121_v50  ;;  %2427 = vmatprep.mubr.msk.f32.mxu1 %vm2843_vm0, %v2844_v1 }
0x1366   :  { %2577 = vmatprep.subr.bf16.mxu1 %v2842_v0 }
0x1369   :  { %2579 = vmatpush3.bf16.msra.mxu1 %v3125_v53 }
0x136a   :  { %2580 = vmatprep.subr.bf16.mxu1 %v2842_v0 }
0x136b   :  { %v1063_v58 = vld [vmem:[#allocation2 + $0x30] sm:$0xff] }
0x136c   :  { %2428 = vmatmul.mubr.f32.vlgmr.msra.gmra.mrb[10].mxu1 %v2844_v1  ;;  %2416 = vmatprep.mubr.msk.f32.mxu0 %vm218_vm2, %v1063_v58 }
0x136d   :  { %2582 = vmatpush3.bf16.msra.mxu1 %v3121_v50  ;;  %2438 = vmatprep.mubr.msk.f32.mxu1 %vm2843_vm0, %v2844_v1 }
0x136e   :  { %2583 = vmatprep.subr.bf16.mxu1 %v2842_v0 }
0x1371   :  { %2585 = vmatpush3.bf16.msra.mxu1 %v3125_v53 }
0x1372   :  { %2592 = vmatprep.subr.bf16.mxu1 %v2842_v0 }
0x1437   :  { %v1022_v62 = vpop.f32.mrb[8].mxu1 }
0x1438   :  { %v1026_v63 = vadd.f32 %v1022_v62, %v202_v61  ;;  %v2398_v2 = vpop.f32.mrb[9].mxu1 }
0x143a   :  { %v2164_v18 = vmul.f32 -1.442695, %v1026_v63 }
0x143f   :  { %v1284_v4 = vpop.f32.mrb[10].mxu1 }
0x1440   :  { %v1288_v6 = vadd.f32 %v1284_v4, %v1167_v3  ;;  %v2429_v7 = vpop.f32.mrb[11].mxu1 }
0x1442   :  { %2694 = vtanh.f32 %v1288_v6  ;;  %v2174_v8 = vmul.f32 -1.442695, %v1288_v6 }
0x1444   :  { %2696 = vpow2.f32 %v2174_v8 }
0x144c   :  { %v2695_v10 = vpop.eup %2694 }
0x144d   :  { %1298 = vrot.lane.b32.xlu0 %v2695_v10, %s2845_s25 }
0x144e   :  { %v2697_v12 = vpop.eup %2696 }
0x144f   :  { %v1292_v59 = vadd.f32 1.0, %v2697_v12 }
0x1451   :  { %2698 = vrcp.f32 %v1292_v59 }
0x145b   :  { %v2699_v9 = vpop.eup %2698 }
0x145c   :  { %v1296_v13 = vmul.f32 0.0, %v2699_v9 }
0x14bf   :  { %v1299_v57 = vpop.permute.xlu0 %1298 }
0x14c0   :  { %v1301_v11 = vmul.f32 %v2699_v9, %v1299_v57 }
0x14c2   :  { %1303 = vrot.lane.b32.xlu1 %v1301_v11, %s2846_s3 }
0x1534   :  { %v1304_v14 = vpop.permute.xlu1 %1303 }
0x1535   :  { %v1306_v15 = vadd.f32 %v1304_v14, %v1296_v13 }
0x1537   :  { %2700 = vtanh.f32 %v1306_v15 }
0x1538   :  { %2702 = vtanh.f32 %v1026_v63  ;;  %v1177_v63 = vadd.f32 %v3151_v5, %v3109_v36 }
0x1539   :  { %2704 = vpow2.f32 %v2164_v18 }
0x1541   :  { %v2701_v16 = vpop.eup %2700 }
0x1542   :  { %1309 = vrot.lane.b32.xlu0 %v2701_v16, %s2845_s25  ;;  %v2703_v17 = vpop.eup %2702 }
0x1543   :  { %v2705_v19 = vpop.eup %2704 }
0x1544   :  { %v1030_v20 = vadd.f32 1.0, %v2705_v19 }
0x1546   :  { %1036 = vrot.lane.b32.xlu0 %v2703_v17, %s2845_s25  ;;  %2706 = vrcp.f32 %v1030_v20  ;;  %v1182_v17 = vadd.f32 %v3107_v34, %v3151_v5 }
0x1550   :  { %v2707_v23 = vpop.eup %2706 }
0x1551   :  { %v1034_v27 = vmul.f32 %v2707_v23, %v3117_v46 }
0x15b4   :  { %v1310_v21 = vpop.permute.xlu0 %1309 }
0x15b5   :  { %v1312_v22 = vmul.f32 %v2699_v9, %v1310_v21 }
0x15b7   :  { %1314 = vrot.lane.b32.xlu1 %v1312_v22, %s2846_s3 }
0x15b8   :  { %v1037_v24 = vpop.permute.xlu0 %1036 }
0x15b9   :  { %v1039_v25 = vmul.f32 %v2707_v23, %v1037_v24 }
0x15bb   :  { %1041 = vrot.lane.b32.xlu0 %v1039_v25, %s2846_s3 }
0x1629   :  { %v1315_v26 = vpop.permute.xlu1 %1314 }
0x162a   :  { %1317 = vst.msk [vmem:[#allocation2] sm:$0xff] %vm218_vm2, %v1315_v26  ;;  %2439 = vmatmul.mubr.msk.f32.vlgmr.msra.gmra.mrb[12].mxu1 %vm218_vm2, %v1315_v26 }
0x162b   :  { %2594 = vmatpush3.bf16.msra.mxu1 %v3121_v50  ;;  %2460 = vmatprep.mubr.msk.f32.mxu1 %vm2843_vm0, %v2844_v1 }
0x162c   :  { %2595 = vmatprep.subr.bf16.mxu1 %v2842_v0 }
0x162d   :  { %v1042_v28 = vpop.permute.xlu0 %1041 }
0x162e   :  { %v1044_v29 = vadd.f32 %v1042_v28, %v1034_v27 }
0x162f   :  { %2597 = vmatpush3.bf16.msra.mxu1 %v3125_v53 }
0x1630   :  { %2708 = vtanh.f32 %v1044_v29  ;;  %2604 = vmatprep.subr.bf16.mxu1 %v2842_v0 }
0x163a   :  { %v2709_v30 = vpop.eup %2708 }
0x163b   :  { %1047 = vrot.lane.b32.xlu0 %v2709_v30, %s2845_s25 }
0x16ad   :  { %v1048_v31 = vpop.permute.xlu0 %1047 }
0x16ae   :  { %v1050_v33 = vmul.f32 %v2707_v23, %v1048_v31 }
0x16b0   :  { %1052 = vrot.lane.b32.xlu0 %v1050_v33, %s2846_s3 }
0x16fd   :  { %v1387_v39 = vpop.f32.mrb[12].mxu1 }
0x16fe   :  { %v1391_v60 = vadd.f32 %v1387_v39, %v1172_v35  ;;  %v2440_v40 = vpop.f32.mrb[13].mxu1  ;;  %v1187_v39 = vadd.f32 %v3151_v5, %v3114_v38 }
0x1700   :  { %2710 = vtanh.f32 %v1391_v60  ;;  %v2176_v44 = vmul.f32 -1.442695, %v1391_v60 }
0x1702   :  { %2712 = vpow2.f32 %v2176_v44 }
0x170a   :  { %v2711_v41 = vpop.eup %2710 }
0x170b   :  { %1401 = vrot.lane.b32.xlu1 %v2711_v41, %s2845_s25 }
0x170c   :  { %v2713_v45 = vpop.eup %2712 }
0x170d   :  { %v1395_v32 = vadd.f32 1.0, %v2713_v45 }
0x170f   :  { %2714 = vrcp.f32 %v1395_v32 }
0x1719   :  { %v2715_v46 = vpop.eup %2714 }
0x171a   :  { %v1399_v49 = vmul.f32 %v2715_v46, %v1306_v15 }
0x1722   :  { %v1053_v42 = vpop.permute.xlu0 %1052 }
0x1723   :  { %1056 = vst.msk [vmem:[#allocation2 + $0x38] sm:$0xff] %vm218_vm2, %v1053_v42 }
0x172a   :  { %v1064_v43 = vld [vmem:[#allocation2 + $0x38] sm:$0xff] }
0x172b   :  { %2417 = vmatmul.mubr.msk.f32.gmra.mrb[20].mxu0 %vm218_vm2, %v1064_v43 }
0x172c   :  { %2449 = vmatprep.mubr.msk.f32.mxu0 %vm2843_vm0, %v2844_v1 }
0x177d   :  { %v1402_v47 = vpop.permute.xlu1 %1401 }
0x177e   :  { %v1404_v48 = vmul.f32 %v2715_v46, %v1402_v47 }
0x1780   :  { %1406 = vrot.lane.b32.xlu1 %v1404_v48, %s2846_s3 }
0x17f2   :  { %v1407_v51 = vpop.permute.xlu1 %1406 }
0x17f3   :  { %v1409_v52 = vadd.f32 %v1407_v51, %v1399_v49 }
0x17f5   :  { %2716 = vtanh.f32 %v1409_v52 }
0x17fe   :  { %v3179_v54 = vpop.f32.mrb[20].mxu0 }
0x17ff   :  { %v2717_v55 = vpop.eup %2716  ;;  %v3181_v56 = vpop.f32.mrb[21].mxu0 }
0x1800   :  { %1412 = vrot.lane.b32.xlu1 %v2717_v55, %s2845_s25 }
0x1872   :  { %v1413_v58 = vpop.permute.xlu1 %1412 }
0x1873   :  { %v1415_v61 = vmul.f32 %v2715_v46, %v1413_v58 }
0x1875   :  { %1417 = vrot.lane.b32.xlu1 %v1415_v61, %s2846_s3  ;;  %v1192_v61 = vadd.f32 %v3112_v37, %v3151_v5 }
0x18e7   :  { %v1418_v62 = vpop.permute.xlu1 %1417 }
0x18e8   :  { %1420 = vst.msk [vmem:[#allocation2 + $0x8] sm:$0xff] %vm218_vm2, %v1418_v62  ;;  %2450 = vmatmul.mubr.msk.f32.vlgmr.msra.gmra.mrb[22].mxu0 %vm218_vm2, %v1418_v62 }
0x18e9   :  { %2600 = vmatpush3.bf16.msra.mxu0 %v3121_v50  ;;  %2471 = vmatprep.mubr.msk.f32.mxu0 %vm2843_vm0, %v2844_v1 }
0x18ea   :  { %2601 = vmatprep.subr.bf16.mxu0 %v2842_v0 }
0x18ed   :  { %2603 = vmatpush3.bf16.msra.mxu0 %v3125_v53 }
0x18ee   :  { %2610 = vmatprep.subr.bf16.mxu0 %v2842_v0 }
0x19bb   :  { %v1490_v2 = vpop.f32.mrb[22].mxu0 }
0x19bc   :  { %v1494_v3 = vadd.f32 %v1490_v2, %v1177_v63  ;;  %v2451_v4 = vpop.f32.mrb[23].mxu0 }
0x19be   :  { %2718 = vtanh.f32 %v1494_v3  ;;  %v2178_v7 = vmul.f32 -1.442695, %v1494_v3 }
0x19c0   :  { %2720 = vpow2.f32 %v2178_v7 }
0x19c8   :  { %v2719_v6 = vpop.eup %2718 }
0x19c9   :  { %1504 = vrot.lane.b32.xlu0 %v2719_v6, %s2845_s25 }
0x19ca   :  { %v2721_v10 = vpop.eup %2720 }
0x19cb   :  { %v1498_v8 = vadd.f32 1.0, %v2721_v10 }
0x19cd   :  { %2722 = vrcp.f32 %v1498_v8 }
0x19d7   :  { %v2723_v12 = vpop.eup %2722 }
0x19d8   :  { %v1502_v57 = vmul.f32 %v2723_v12, %v1409_v52 }
0x1a3b   :  { %v1505_v59 = vpop.permute.xlu0 %1504 }
0x1a3c   :  { %v1507_v9 = vmul.f32 %v2723_v12, %v1505_v59 }
0x1a3e   :  { %1509 = vrot.lane.b32.xlu1 %v1507_v9, %s2846_s3 }
0x1ab0   :  { %v1510_v11 = vpop.permute.xlu1 %1509 }
0x1ab1   :  { %v1512_v36 = vadd.f32 %v1510_v11, %v1502_v57 }
0x1ab3   :  { %2724 = vtanh.f32 %v1512_v36 }
0x1abd   :  { %v2725_v13 = vpop.eup %2724 }
0x1abe   :  { %1515 = vrot.lane.b32.xlu0 %v2725_v13, %s2845_s25 }
0x1b30   :  { %v1516_v14 = vpop.permute.xlu0 %1515 }
0x1b31   :  { %v1518_v15 = vmul.f32 %v2723_v12, %v1516_v14 }
0x1b33   :  { %1520 = vrot.lane.b32.xlu1 %v1518_v15, %s2846_s3 }
0x1ba5   :  { %v1521_v16 = vpop.permute.xlu1 %1520 }
0x1ba6   :  { %1523 = vst.msk [vmem:[#allocation2 + $0x10] sm:$0xff] %vm218_vm2, %v1521_v16  ;;  %2461 = vmatmul.mubr.msk.f32.vlgmr.msra.gmra.mrb[14].mxu1 %vm218_vm2, %v1521_v16 }
0x1ba7   :  { %2606 = vmatpush3.bf16.msra.mxu1 %v3121_v50  ;;  %2482 = vmatprep.mubr.msk.f32.mxu1 %vm2843_vm0, %v2844_v1 }
0x1ba8   :  { %2607 = vmatprep.subr.bf16.mxu1 %v2842_v0 }
0x1bab   :  { %2609 = vmatpush3.bf16.msra.mxu1 %v3125_v53 }
0x1bac   :  { %2616 = vmatprep.subr.bf16.mxu1 %v2842_v0 }
0x1c79   :  { %v1593_v18 = vpop.f32.mrb[14].mxu1 }
0x1c7a   :  { %v1597_v19 = vadd.f32 %v1593_v18, %v1182_v17  ;;  %v2462_v20 = vpop.f32.mrb[15].mxu1 }
0x1c7c   :  { %2726 = vtanh.f32 %v1597_v19  ;;  %v2180_v22 = vmul.f32 -1.442695, %v1597_v19 }
0x1c7e   :  { %2728 = vpow2.f32 %v2180_v22 }
0x1c86   :  { %v2727_v21 = vpop.eup %2726 }
0x1c87   :  { %1607 = vrot.lane.b32.xlu0 %v2727_v21, %s2845_s25 }
0x1c88   :  { %v2729_v23 = vpop.eup %2728 }
0x1c89   :  { %v1601_v24 = vadd.f32 1.0, %v2729_v23 }
0x1c8b   :  { %2730 = vrcp.f32 %v1601_v24 }
0x1c95   :  { %v2731_v25 = vpop.eup %2730 }
0x1c96   :  { %v1605_v28 = vmul.f32 %v2731_v25, %v1512_v36  ;;  %v1197_v36 = vadd.f32 %v3151_v5, %v3181_v56 }
0x1cf9   :  { %v1608_v26 = vpop.permute.xlu0 %1607 }
0x1cfa   :  { %v1610_v27 = vmul.f32 %v2731_v25, %v1608_v26 }
0x1cfc   :  { %1612 = vrot.lane.b32.xlu1 %v1610_v27, %s2846_s3 }
0x1d6e   :  { %v1613_v29 = vpop.permute.xlu1 %1612 }
0x1d6f   :  { %v1615_v34 = vadd.f32 %v1613_v29, %v1605_v28  ;;  %v1202_v28 = vadd.f32 %v3179_v54, %v3151_v5 }
0x1d71   :  { %2732 = vtanh.f32 %v1615_v34 }
0x1d7b   :  { %v2733_v30 = vpop.eup %2732 }
0x1d7c   :  { %1618 = vrot.lane.b32.xlu0 %v2733_v30, %s2845_s25 }
0x1dee   :  { %v1619_v31 = vpop.permute.xlu0 %1618 }
0x1def   :  { %v1621_v33 = vmul.f32 %v2731_v25, %v1619_v31 }
0x1df1   :  { %1623 = vrot.lane.b32.xlu1 %v1621_v33, %s2846_s3 }
0x1e63   :  { %v1624_v35 = vpop.permute.xlu1 %1623 }
0x1e64   :  { %1626 = vst.msk [vmem:[#allocation2 + $0x18] sm:$0xff] %vm218_vm2, %v1624_v35  ;;  %2472 = vmatmul.mubr.msk.f32.vlgmr.msra.gmra.mrb[24].mxu0 %vm218_vm2, %v1624_v35 }
0x1e65   :  { %2612 = vmatpush3.bf16.msra.mxu0 %v3121_v50  ;;  %2493 = vmatprep.mubr.msk.f32.mxu0 %vm2843_vm0, %v2844_v1 }
0x1e66   :  { %2613 = vmatprep.subr.bf16.mxu0 %v2842_v0 }
0x1e69   :  { %2615 = vmatpush3.bf16.msra.mxu0 %v3125_v53 }
0x1e6a   :  { %2622 = vmatprep.subr.bf16.mxu0 %v2842_v0 }
0x1f37   :  { %v1696_v60 = vpop.f32.mrb[24].mxu0 }
0x1f38   :  { %v1700_v40 = vadd.f32 %v1696_v60, %v1187_v39  ;;  %v2473_v41 = vpop.f32.mrb[25].mxu0 }
0x1f3a   :  { %2734 = vtanh.f32 %v1700_v40  ;;  %v2182_v43 = vmul.f32 -1.442695, %v1700_v40 }
0x1f3c   :  { %2736 = vpow2.f32 %v2182_v43 }
0x1f44   :  { %v2735_v42 = vpop.eup %2734 }
0x1f45   :  { %1710 = vrot.lane.b32.xlu0 %v2735_v42, %s2845_s25 }
0x1f46   :  { %v2737_v44 = vpop.eup %2736 }
0x1f47   :  { %v1704_v45 = vadd.f32 1.0, %v2737_v44  ;;  %v2040_v44 = vld [vmem:[%s3295_s7] sm:$0xff] }
0x1f49   :  { %2738 = vrcp.f32 %v1704_v45  ;;  %v2041_v45 = vld [vmem:[%s3295_s7 + $0x8] sm:$0xff] }
0x1f53   :  { %v2739_v32 = vpop.eup %2738 }
0x1f54   :  { %v1708_v48 = vmul.f32 %v2739_v32, %v1615_v34 }
0x1fb7   :  { %v1711_v46 = vpop.permute.xlu0 %1710 }
0x1fb8   :  { %v1713_v47 = vmul.f32 %v2739_v32, %v1711_v46  ;;  %v2042_v46 = vld [vmem:[%s3295_s7 + $0x10] sm:$0xff] }
0x1fba   :  { %1715 = vrot.lane.b32.xlu1 %v1713_v47, %s2846_s3  ;;  %v2043_v47 = vld [vmem:[%s3295_s7 + $0x18] sm:$0xff]  ;;  %s2847_s7 = smov [#allocation9]  }
0x1fbb   :  { %s2131_s1 = sshll.u32 %s2847_s7, 4  ;;  %s2132_s1 = int_to_ptr.vmem [resolvable:$true] %s2131_s1 }
0x1fbc   :  { %s2810_s10 = scalar_lea.vmem %s2132_s1, 128  ;;  %p2815_p3 = scmp.lt.s32.totalorder %s2132_s1, %s2132_s1 }
0x1fbd   :  { %p2811_p2 = scmp.ne.s32.totalorder %s2132_s1, %s2810_s10  ;;  %p2816_p4 = scmp.lt.s32.totalorder %s2810_s10, %s2810_s10 }
0x1fbf   :  { %p2817_p5 = por %p2816_p4, %p2815_p3 }
0x1fc1   :  { %p2818_p6 = pnand %p2817_p5, %p2811_p2 }
0x202c   :  { %v1716_v49 = vpop.permute.xlu1 %1715 }
0x202d   :  { %v1718_v38 = vadd.f32 %v1716_v49, %v1708_v48  ;;  %v2626_v48 = vpack.c.bf16 %v2043_v47, %v2042_v46 }
0x202f   :  { %2740 = vtanh.f32 %v1718_v38 }
0x2039   :  { %v2741_v51 = vpop.eup %2740 }
0x203a   :  { %1721 = vrot.lane.b32.xlu0 %v2741_v51, %s2845_s25 }
0x20ac   :  { %v1722_v52 = vpop.permute.xlu0 %1721 }
0x20ad   :  { %v1724_v55 = vmul.f32 %v2739_v32, %v1722_v52  ;;  %v2623_v32 = vpack.c.bf16 %v2041_v45, %v2040_v44 }
0x20af   :  { %1726 = vrot.lane.b32.xlu1 %v1724_v55, %s2846_s3  ;;  %v2189_v55 = vld [vmem:[%s3296_s8] ss:$0 sm:$0xff] }
0x2121   :  { %v1727_v58 = vpop.permute.xlu1 %1726 }
0x2122   :  { %1729 = vst.msk [vmem:[#allocation2 + $0x20] sm:$0xff] %vm218_vm2, %v1727_v58  ;;  %2483 = vmatmul.mubr.msk.f32.vlgmr.msra.gmra.mrb[16].mxu1 %vm218_vm2, %v1727_v58 }
0x2123   :  { %2618 = vmatpush3.bf16.msra.mxu1 %v3121_v50  ;;  %2504 = vmatprep.mubr.msk.f32.mxu1 %vm2843_vm0, %v2844_v1 }
0x2124   :  { %2619 = vmatprep.subr.bf16.mxu1 %v2842_v0 }
0x2127   :  { %2621 = vmatpush3.bf16.msra.mxu1 %v3125_v53 }
0x21f5   :  { %v1799_v62 = vpop.f32.mrb[16].mxu1 }
0x21f6   :  { %v1803_v63 = vadd.f32 %v1799_v62, %v1192_v61  ;;  %v2484_v2 = vpop.f32.mrb[17].mxu1 }
0x21f8   :  { %2742 = vtanh.f32 %v1803_v63  ;;  %v2184_v4 = vmul.f32 -1.442695, %v1803_v63 }
0x21fa   :  { %2744 = vpow2.f32 %v2184_v4 }
0x2202   :  { %v2743_v3 = vpop.eup %2742 }
0x2203   :  { %1813 = vrot.lane.b32.xlu0 %v2743_v3, %s2845_s25 }
0x2204   :  { %v2745_v50 = vpop.eup %2744 }
0x2205   :  { %v1807_v6 = vadd.f32 1.0, %v2745_v50 }
0x2207   :  { %2746 = vrcp.f32 %v1807_v6 }
0x2211   :  { %v2747_v7 = vpop.eup %2746 }
0x2212   :  { %v1811_v53 = vmul.f32 %v2747_v7, %v1718_v38 }
0x2275   :  { %v1814_v10 = vpop.permute.xlu0 %1813 }
0x2276   :  { %v1816_v8 = vmul.f32 %v2747_v7, %v1814_v10 }
0x2278   :  { %1818 = vrot.lane.b32.xlu1 %v1816_v8, %s2846_s3 }
0x22ea   :  { %v1819_v12 = vpop.permute.xlu1 %1818 }
0x22eb   :  { %v1821_v37 = vadd.f32 %v1819_v12, %v1811_v53 }
0x22ed   :  { %2748 = vtanh.f32 %v1821_v37 }
0x22f7   :  { %v2749_v59 = vpop.eup %2748 }
0x22f8   :  { %1824 = vrot.lane.b32.xlu0 %v2749_v59, %s2845_s25 }
0x236a   :  { %v1825_v9 = vpop.permute.xlu0 %1824 }
0x236b   :  { %v1827_v57 = vmul.f32 %v2747_v7, %v1825_v9 }
0x236d   :  { %1829 = vrot.lane.b32.xlu1 %v1827_v57, %s2846_s3 }
0x23df   :  { %v1830_v11 = vpop.permute.xlu1 %1829 }
0x23e0   :  { %1832 = vst.msk [vmem:[#allocation2 + $0x28] sm:$0xff] %vm218_vm2, %v1830_v11  ;;  %2494 = vmatmul.mubr.msk.f32.vlgmr.msra.gmra.mrb[26].mxu0 %vm218_vm2, %v1830_v11 }
0x23e1   :  { %2515 = vmatprep.mubr.msk.f32.mxu0 %vm2843_vm0, %v2844_v1  ;;  %2624 = vmatpush3.bf16.msra.mxu0 %v2623_v32 }
0x23e2   :  { %2625 = vmatprep.subr.bf16.mxu0 %v2842_v0 }
0x23e5   :  { %2627 = vmatpush3.bf16.msra.mxu0 %v2626_v48 }
0x24b3   :  { %v1902_v13 = vpop.f32.mrb[26].mxu0 }
0x24b4   :  { %v1906_v14 = vadd.f32 %v1902_v13, %v1197_v36  ;;  %v2495_v15 = vpop.f32.mrb[27].mxu0 }
0x24b6   :  { %2750 = vtanh.f32 %v1906_v14  ;;  %v2186_v17 = vmul.f32 -1.442695, %v1906_v14 }
0x24b8   :  { %2752 = vpow2.f32 %v2186_v17 }
0x24c0   :  { %v2751_v16 = vpop.eup %2750 }
0x24c1   :  { %1916 = vrot.lane.b32.xlu0 %v2751_v16, %s2845_s25 }
0x24c2   :  { %v2753_v18 = vpop.eup %2752 }
0x24c3   :  { %v1910_v19 = vadd.f32 1.0, %v2753_v18 }
0x24c5   :  { %2754 = vrcp.f32 %v1910_v19 }
0x24cf   :  { %v2755_v20 = vpop.eup %2754 }
0x24d0   :  { %v1914_v1 = vmul.f32 %v2755_v20, %v1821_v37 }
0x2533   :  { %v1917_v21 = vpop.permute.xlu0 %1916 }
0x2534   :  { %v1919_v22 = vmul.f32 %v2755_v20, %v1917_v21 }
0x2536   :  { %1921 = vrot.lane.b32.xlu1 %v1919_v22, %s2846_s3 }
0x25a8   :  { %v1922_v23 = vpop.permute.xlu1 %1921 }
0x25a9   :  { %v1924_v56 = vadd.f32 %v1922_v23, %v1914_v1 }
0x25ab   :  { %2756 = vtanh.f32 %v1924_v56 }
0x25b5   :  { %v2757_v24 = vpop.eup %2756 }
0x25b6   :  { %1927 = vrot.lane.b32.xlu0 %v2757_v24, %s2845_s25 }
0x2628   :  { %v1928_v25 = vpop.permute.xlu0 %1927 }
0x2629   :  { %v1930_v26 = vmul.f32 %v2755_v20, %v1928_v25 }
0x262b   :  { %1932 = vrot.lane.b32.xlu1 %v1930_v26, %s2846_s3 }
0x269d   :  { %v1933_v27 = vpop.permute.xlu1 %1932 }
0x269e   :  { %1935 = vst.msk [vmem:[#allocation2 + $0x30] sm:$0xff] %vm218_vm2, %v1933_v27  ;;  %2505 = vmatmul.mubr.msk.f32.vlgmr.msra.gmra.mrb[18].mxu1 %vm218_vm2, %v1933_v27 }
0x2771   :  { %v2005_v29 = vpop.f32.mrb[18].mxu1 }
0x2772   :  { %v2009_v34 = vadd.f32 %v2005_v29, %v1202_v28  ;;  %v2506_v30 = vpop.f32.mrb[19].mxu1 }
0x2774   :  { %2758 = vtanh.f32 %v2009_v34  ;;  %v2188_v33 = vmul.f32 -1.442695, %v2009_v34 }
0x2776   :  { %2760 = vpow2.f32 %v2188_v33 }
0x277e   :  { %v2759_v31 = vpop.eup %2758 }
0x277f   :  { %2019 = vrot.lane.b32.xlu0 %v2759_v31, %s2845_s25 }
0x2780   :  { %v2761_v35 = vpop.eup %2760 }
0x2781   :  { %v2013_v39 = vadd.f32 1.0, %v2761_v35 }
0x2783   :  { %2762 = vrcp.f32 %v2013_v39 }
0x278d   :  { %v2763_v60 = vpop.eup %2762 }
0x278e   :  { %v2017_v42 = vmul.f32 %v2763_v60, %v1924_v56 }
0x27f1   :  { %v2020_v40 = vpop.permute.xlu0 %2019 }
0x27f2   :  { %v2022_v41 = vmul.f32 %v2763_v60, %v2020_v40 }
0x27f4   :  { %2024 = vrot.lane.b32.xlu1 %v2022_v41, %s2846_s3 }
0x2866   :  { %v2025_v43 = vpop.permute.xlu1 %2024 }
0x2867   :  { %v2027_v5 = vadd.f32 %v2025_v43, %v2017_v42 }
0x2869   :  { %2764 = vtanh.f32 %v2027_v5 }
0x2873   :  { %v2765_v54 = vpop.eup %2764 }
0x2874   :  { %2030 = vrot.lane.b32.xlu0 %v2765_v54, %s2845_s25 }
0x28e6   :  { %v2031_v49 = vpop.permute.xlu0 %2030 }
0x28e7   :  { %v2033_v38 = vmul.f32 %v2763_v60, %v2031_v49 }
0x28e9   :  { %2035 = vrot.lane.b32.xlu1 %v2033_v38, %s2846_s3 }
0x295b   :  { %v2036_v51 = vpop.permute.xlu1 %2035 }
0x295c   :  { %2038 = vst.msk [vmem:[#allocation2 + $0x38] sm:$0xff] %vm218_vm2, %v2036_v51 }
0x2963   :  { %v2039_v52 = vld [vmem:[#allocation2 + $0x38] sm:$0xff] }
0x2964   :  { %2516 = vmatmul.mubr.msk.f32.vlgmr.msra.gmra.mrb[28].mxu0 %vm218_vm2, %v2039_v52 }
0x2a37   :  { %v2120_v58 = vpop.f32.mrb[28].mxu0 }
0x2a38   :  { %v2121_v61 = vadd.f32 %v2189_v55, %v2120_v58  ;;  %v2517_v0 = vpop.f32.mrb[29].mxu0 }
0x2a3a   :  { %2124 = vst [vmem:[#allocation9] sm:$0xff] %v2121_v61 }
0x2a3b   :  { %2821 = shalt.err (!%p2818_p6)
}
0x2a3c   :  { %s2822_s13 = scalar_lea.hbm %s3297_s9, 128 }
0x2a3d   :  { %p2823_p7 = scmp.ne.s32.totalorder %s3297_s9, %s2822_s13  ;;  %p2826_p8 = scmp.lt.u32.totalorder %s2822_s13, %s3297_s9 }
0x2a3f   :  { %p2828_p9 = pnand %p2826_p8, %p2823_p7 }
0x2a41   :  { %2831 = shalt.err (!%p2828_p9)
}
0x2a42   :  { %2134 = dma.vmem_to_hbm [thread:$0]  %s2132_s1, 128, %s3297_s9, [#allocation6]  }
0x2a43   :  { %2836 = dma.done.wait [#allocation6], 128  }
0x2a44   :  { %2837 = vsyncadd [#allocation6], 4294967168 }
0x2a45   :  { %2138 = vsyncpa [#allocation5], 1 }
0x2a46   :  { %2139 = vsyncpa [#allocation8], 1 }
0x2a47   :  { %2140 = vsyncpa [#allocation6], 1 }

</bundles_post_ra>
